<compile_context>
chip_gen: v5e
topology: v5e:2x2
jax: 0.10.0
libtpu: 0.0.40
codegen_flags: <defaults>
</compile_context>

<pallas_src>
import math

import jax
import jax.numpy as jnp
import numpy as np
from jax import lax
from jax.experimental import pallas as pl
from jax.experimental.pallas import tpu as pltpu

# ---------------- model config (small, consistent with the module) ----------
VOCAB = 64
HIDDEN = 32
N_HEADS = 4
HEAD_DIM = HIDDEN // N_HEADS          # 8
INTERMEDIATE = 64
EPS = 1e-5
NUM_BLOCKS = 2
BATCH = 2
SEQ = 8
BN = BATCH * SEQ
OUT_W = 128                            # lane-dense logits width (>= VOCAB)

# consts slab column layout
COS_OFF = 0
SIN_OFF = HIDDEN
BIAS_OFF = 2 * HIDDEN
HM_OFF = 2 * HIDDEN + BN
CONST_W = HM_OFF + N_HEADS * HIDDEN    # 208

# layer_w slab column layout
WQKV_OFF = 0                           # wq|wk|wv (norm1 folded)
WO_OFF = 3 * HIDDEN                    # wo
W13_OFF = 4 * HIDDEN                   # w1|w3   (norm2 folded)
LAYER_W = W13_OFF + 2 * INTERMEDIATE   # 256


# ---------------------------- Pallas kernel ---------------------------------
def fused_forward_kernel(ids_ref, consts_ref, embrot_ref, lm_ref,
                         layerw_ref, w2_ref, out_ref):
    f32 = jnp.float32

    def rmsnorm(x):                       # gain is pre-folded into weights
        var = jnp.mean(x * x, axis=-1, keepdims=True)
        return x * lax.rsqrt(var + EPS)

    c = consts_ref[...]                   # (BN, 208) precomputed constants
    cosf = c[:, COS_OFF:COS_OFF + HIDDEN]
    sinf = c[:, SIN_OFF:SIN_OFF + HIDDEN]
    bias = c[:, BIAS_OFF:BIAS_OFF + BN]   # block-causal (BN, BN) bias

    emb = embrot_ref[0:VOCAB, :]          # (V, H)
    rot = embrot_ref[VOCAB:VOCAB + HIDDEN, :]   # (H, H) rope pair-swap matrix

    # token embedding: one-hot @ embedding (gather-free MXU matmul)
    ids = ids_ref[...]                                            # (BN, 1) i32
    vocab_iota = lax.broadcasted_iota(jnp.int32, (BN, VOCAB), 1)
    onehot = jnp.where(ids == vocab_iota, 1.0, 0.0).astype(f32)
    x = jnp.dot(onehot, emb, preferred_element_type=f32)          # (BN, H)

    scale = 1.0 / math.sqrt(HEAD_DIM)

    # interleaved-pair rotary embedding: rope(t) = t*cos + (t @ rot)*sin
    def rope(t):
        return t * cosf + jnp.dot(t, rot, preferred_element_type=f32) * sinf

    for l in range(NUM_BLOCKS):
        wl = layerw_ref[l]                                        # (H, 256)

        # ---- attention sub-block (norm1 folded into wqkv rows) ----
        xn = rmsnorm(x)
        qkv = jnp.dot(xn, wl[:, WQKV_OFF:WQKV_OFF + 3 * HIDDEN],
                      preferred_element_type=f32)                 # (BN, 3H)
        q = rope(qkv[:, 0:HIDDEN]) * scale
        k = rope(qkv[:, HIDDEN:2 * HIDDEN])
        v = qkv[:, 2 * HIDDEN:3 * HIDDEN]

        attn = jnp.zeros((BN, HIDDEN), f32)
        for h in range(N_HEADS):
            hm = c[:, HM_OFF + h * HIDDEN:HM_OFF + (h + 1) * HIDDEN]  # 0/1 mask
            km = k * hm                     # restrict contraction to head h
            vm = v * hm                     # output lands only in head h cols
            s = lax.dot_general(q, km, (((1,), (1,)), ((), ())),
                                preferred_element_type=f32)       # (BN, BN)
            s = s + bias
            m = jnp.max(s, axis=-1, keepdims=True)
            p = jnp.exp(s - m)
            denom = jnp.sum(p, axis=-1, keepdims=True)
            p = p * pl.reciprocal(denom, approx=True)
            attn = attn + jnp.dot(p, vm, preferred_element_type=f32)

        x = x + jnp.dot(attn, wl[:, WO_OFF:WO_OFF + HIDDEN],
                        preferred_element_type=f32)

        # ---- MLP sub-block, SwiGLU (norm2 folded into w1|w3 rows) ----
        xn2 = rmsnorm(x)
        gu = jnp.dot(xn2, wl[:, W13_OFF:W13_OFF + 2 * INTERMEDIATE],
                     preferred_element_type=f32)                  # (BN, 128)
        g = gu[:, 0:INTERMEDIATE]
        u = gu[:, INTERMEDIATE:2 * INTERMEDIATE]
        act = g * pl.reciprocal(1.0 + jnp.exp(-g), approx=True)   # silu (EUP)
        x = x + jnp.dot(act * u, w2_ref[l], preferred_element_type=f32)

    # ---- final norm (gain folded into lm_head rows) + lane-dense lm head ----
    xf = rmsnorm(x)
    out_ref[...] = jnp.dot(xf, lm_ref[...], preferred_element_type=f32)


# ---------------------------- wrapper ----------------------------------------
def _forward(input_ids, packed):
    B, N = input_ids.shape
    ids = input_ids.reshape(B * N, 1).astype(jnp.int32)
    vmem = pl.BlockSpec(memory_space=pltpu.MemorySpace.VMEM)
    out = pl.pallas_call(
        fused_forward_kernel,
        out_shape=jax.ShapeDtypeStruct((B * N, OUT_W), jnp.float32),
        in_specs=[vmem] * 6,
        out_specs=vmem,
    )(ids, packed["consts"], packed["embrot"], packed["lm_head"],
      packed["layer_w"], packed["w2"])
    return out[:, :VOCAB].reshape(B, N, VOCAB)


transformer_forward = jax.jit(_forward)


# ------------------ one-time packing (hoisted out of the forward) -----------
def pack_weights(weights):
    # rotary tables (interleaved-pair rope expanded to full hidden width)
    j = np.arange(0, HEAD_DIM, 2, dtype=np.float32) / HEAD_DIM
    theta = 1.0 / (10000.0 ** j)                       # (hd/2,)
    pos = np.arange(SEQ, dtype=np.float32)
    ang = pos[:, None] * theta[None, :]                # (SEQ, hd/2)
    cos_hd = np.repeat(np.cos(ang), 2, axis=-1)        # (SEQ, hd)
    sin_hd = np.repeat(np.sin(ang), 2, axis=-1)
    cos_bn = np.tile(np.tile(cos_hd, (1, N_HEADS)), (BATCH, 1))   # (BN, H)
    sin_bn = np.tile(np.tile(sin_hd, (1, N_HEADS)), (BATCH, 1))

    # block-causal bias over flattened (B*N) rows (finite large negative)
    ri = np.arange(BN)[:, None]
    ci = np.arange(BN)[None, :]
    allowed = (ri // SEQ == ci // SEQ) & (ci <= ri)
    bias = np.where(allowed, 0.0, -1e30)               # (BN, BN)

    # per-head lane masks, broadcast over rows: (BN, N_HEADS*H)
    lane = np.arange(HIDDEN)
    hmask = np.concatenate(
        [np.tile((lane // HEAD_DIM == h).astype(np.float32)[None, :], (BN, 1))
         for h in range(N_HEADS)], axis=1)

    consts = np.concatenate([cos_bn, sin_bn, bias, hmask],
                            axis=1).astype(np.float32)            # (BN, 208)
    assert consts.shape == (BN, CONST_W)

    # rope pair-swap/sign matrix: (t @ rot)[2p] = -t[2p+1], [2p+1] = t[2p]
    rot = np.zeros((HIDDEN, HIDDEN), np.float32)
    for p in range(HIDDEN // 2):
        rot[2 * p + 1, 2 * p] = -1.0
        rot[2 * p, 2 * p + 1] = 1.0

    embrot = jnp.concatenate([weights["embedding"], jnp.asarray(rot)], axis=0)

    # final RMSNorm gain folded into lm_head rows; zero-pad to 128 lanes.
    fn = weights["final_norm"].reshape(-1)
    lm_p = jnp.concatenate(
        [weights["lm_head"] * fn[:, None],
         jnp.zeros((HIDDEN, OUT_W - VOCAB), jnp.float32)], axis=1)  # (H, 128)

    layer_w, w2s = [], []
    for blk in weights["blocks"]:
        n1 = blk["norm1"].reshape(-1)[:, None]
        n2 = blk["norm2"].reshape(-1)[:, None]
        wqkv = jnp.concatenate([blk["wq"], blk["wk"], blk["wv"]], axis=1) * n1
        w13 = jnp.concatenate([blk["w1"], blk["w3"]], axis=1) * n2
        layer_w.append(jnp.concatenate([wqkv, blk["wo"], w13], axis=1))
        w2s.append(blk["w2"])
    layer_w = jnp.stack(layer_w, axis=0)               # (L, H, 256)
    w2 = jnp.stack(w2s, axis=0)                        # (L, I, H)
    assert layer_w.shape == (NUM_BLOCKS, HIDDEN, LAYER_W)

    packed = {"consts": jnp.asarray(consts), "embrot": embrot,
              "lm_head": lm_p, "layer_w": layer_w, "w2": w2}
    return jax.tree_util.tree_map(jax.device_put, packed)


# ------------------------ pure-JAX reference (for checking) ------------------
def _ref_rmsnorm(x, w):
    var = jnp.mean(x * x, axis=-1, keepdims=True)
    return x * lax.rsqrt(var + EPS) * w.reshape(-1)


def reference_forward(input_ids, weights):
    B, N = input_ids.shape
    hidden = jnp.take(weights["embedding"], input_ids, axis=0)

    j = jnp.arange(0, HEAD_DIM, 2, dtype=jnp.float32) / HEAD_DIM
    theta = 1.0 / (10000.0 ** j)
    pos = jnp.arange(N, dtype=jnp.float32)
    ang = pos[:, None] * theta[None, :]
    cos_h, sin_h = jnp.cos(ang), jnp.sin(ang)

    def rope(t):  # (B, N, nh, hd)
        te, to = t[..., 0::2], t[..., 1::2]
        c = cos_h[None, :, None, :]
        s = sin_h[None, :, None, :]
        oe = te * c - to * s
        oo = to * c + te * s
        return jnp.stack([oe, oo], axis=-1).reshape(t.shape)

    for blk in weights["blocks"]:
        xn = _ref_rmsnorm(hidden, blk["norm1"])
        q = (xn @ blk["wq"]).reshape(B, N, N_HEADS, HEAD_DIM)
        k = (xn @ blk["wk"]).reshape(B, N, N_HEADS, HEAD_DIM)
        v = (xn @ blk["wv"]).reshape(B, N, N_HEADS, HEAD_DIM)
        q, k = rope(q), rope(k)
        qt, kt, vt = (q.transpose(0, 2, 1, 3), k.transpose(0, 2, 1, 3),
                      v.transpose(0, 2, 1, 3))
        s = jnp.einsum("bhnd,bhmd->bhnm", qt, kt) / math.sqrt(HEAD_DIM)
        mask = jnp.triu(jnp.full((N, N), -jnp.inf), k=1)
        s = s + mask[None, None]
        p = jax.nn.softmax(s, axis=-1)
        o = jnp.einsum("bhnm,bhmd->bhnd", p, vt)
        o = o.transpose(0, 2, 1, 3).reshape(B, N, HIDDEN)
        hidden = hidden + o @ blk["wo"]
        xn2 = _ref_rmsnorm(hidden, blk["norm2"])
        hidden = hidden + (jax.nn.silu(xn2 @ blk["w1"]) * (xn2 @ blk["w3"])) @ blk["w2"]

    hidden = _ref_rmsnorm(hidden, weights["final_norm"])
    return hidden @ weights["lm_head"]


# ------------------------------ init -----------------------------------------
def make_weights(key):
    def nrm(k, shape, scale=0.02):
        return (scale * jax.random.normal(k, shape)).astype(jnp.float32)

    keys = jax.random.split(key, 2 + NUM_BLOCKS)
    weights = {
        "embedding": nrm(keys[0], (VOCAB, HIDDEN)),
        "final_norm": jnp.ones((1, HIDDEN), jnp.float32),
        "lm_head": nrm(keys[1], (HIDDEN, VOCAB)),
    }
    blocks = []
    for b in range(NUM_BLOCKS):
        bk = jax.random.split(keys[2 + b], 7)
        blocks.append({
            "norm1": jnp.ones((1, HIDDEN), jnp.float32),
            "wq": nrm(bk[0], (HIDDEN, HIDDEN)),
            "wk": nrm(bk[1], (HIDDEN, HIDDEN)),
            "wv": nrm(bk[2], (HIDDEN, HIDDEN)),
            "wo": nrm(bk[3], (HIDDEN, HIDDEN)),
            "norm2": jnp.ones((1, HIDDEN), jnp.float32),
            "w1": nrm(bk[4], (HIDDEN, INTERMEDIATE)),
            "w2": nrm(bk[5], (INTERMEDIATE, HIDDEN)),
            "w3": nrm(bk[6], (HIDDEN, INTERMEDIATE)),
        })
    weights["blocks"] = blocks
    return weights


if __name__ == "__main__":
    key = jax.random.PRNGKey(0)
    kw, ki = jax.random.split(key)
    weights = make_weights(kw)
    packed = pack_weights(weights)        # one-time packing, cached with weights
    input_ids = jax.random.randint(ki, (BATCH, SEQ), 0, VOCAB, dtype=jnp.int32)

    logits = jax.block_until_ready(transformer_forward(input_ids, packed))
    ref = jax.block_until_ready(reference_forward(input_ids, weights))

    # tolerance consciously loosened slightly for the approx-reciprocal
    # (EUP) softmax / silu paths (per perf review).
    np.testing.assert_allclose(np.asarray(logits), np.asarray(ref),
                               rtol=2e-3, atol=2e-3)
    assert logits.shape == (BATCH, SEQ, VOCAB)
    print("KERNEL_OK")
</pallas_src>

<mosaic_0001>
module attributes {stable_mosaic.version = 11 : i64} {
  func.func @fused_forward_kernel(%arg0: memref<16x1xi32, #tpu.memory_space<vmem>>, %arg1: memref<16x208xf32, #tpu.memory_space<vmem>>, %arg2: memref<96x32xf32, #tpu.memory_space<vmem>>, %arg3: memref<32x128xf32, #tpu.memory_space<vmem>>, %arg4: memref<2x32x256xf32, #tpu.memory_space<vmem>>, %arg5: memref<2x64x32xf32, #tpu.memory_space<vmem>>, %arg6: memref<16x128xf32, #tpu.memory_space<vmem>>) attributes {dimension_semantics = [], scalar_prefetch = 0 : i64, scratch_operands = 0 : i64, tpu.core_type = #tpu.core_type<tc>} {
    %c0 = arith.constant 0 : index
    %c0_0 = arith.constant 0 : index
    %0 = vector.load %arg1[%c0, %c0_0] : memref<16x208xf32, #tpu.memory_space<vmem>>, vector<16x208xf32>
    %1 = vector.extract_strided_slice %0 {offsets = [0, 0], sizes = [16, 32], strides = [1, 1]} : vector<16x208xf32> to vector<16x32xf32>
    %2 = vector.extract_strided_slice %0 {offsets = [0, 32], sizes = [16, 32], strides = [1, 1]} : vector<16x208xf32> to vector<16x32xf32>
    %3 = vector.extract_strided_slice %0 {offsets = [0, 64], sizes = [16, 16], strides = [1, 1]} : vector<16x208xf32> to vector<16x16xf32>
    %c0_1 = arith.constant 0 : index
    %c0_2 = arith.constant 0 : index
    %4 = vector.load %arg2[%c0_1, %c0_2] : memref<96x32xf32, #tpu.memory_space<vmem>>, vector<64x32xf32>
    %c64 = arith.constant 64 : index
    %c0_3 = arith.constant 0 : index
    %5 = vector.load %arg2[%c64, %c0_3] : memref<96x32xf32, #tpu.memory_space<vmem>>, vector<32x32xf32>
    %c0_4 = arith.constant 0 : index
    %c0_5 = arith.constant 0 : index
    %6 = vector.load %arg0[%c0_4, %c0_5] : memref<16x1xi32, #tpu.memory_space<vmem>>, vector<16x1xi32>
    %7 = tpu.iota {dimensions = array<i32: 1>} : vector<16x64xi32>
    %8 = vector.broadcast %6 : vector<16x1xi32> to vector<16x64xi32>
    %9 = arith.cmpi eq, %8, %7 : vector<16x64xi32>
    %cst = arith.constant 1.000000e+00 : f32
    %cst_6 = arith.constant 0.000000e+00 : f32
    %10 = vector.broadcast %cst : f32 to vector<16x64xf32>
    %11 = vector.broadcast %cst_6 : f32 to vector<16x64xf32>
    %12 = arith.select %9, %10, %11 : vector<16x64xi1>, vector<16x64xf32>
    %cst_7 = arith.constant dense<0.000000e+00> : vector<16x32xf32>
    %13 = tpu.matmul %12, %4, %cst_7 {dimension_numbers = #tpu.dot_dimension_numbers<[1], [0], [0], [1], [0, 0, 1, 1], [], []>} : vector<16x64xf32>, vector<64x32xf32>, vector<16x32xf32> -> vector<16x32xf32>
    %c0_8 = arith.constant 0 : index
    %c0_9 = arith.constant 0 : index
    %c0_10 = arith.constant 0 : index
    %14 = vector.load %arg4[%c0_8, %c0_9, %c0_10] : memref<2x32x256xf32, #tpu.memory_space<vmem>>, vector<1x32x256xf32>
    %15 = vector.shape_cast %14 : vector<1x32x256xf32> to vector<32x256xf32>
    %16 = arith.mulf %13, %13 : vector<16x32xf32>
    %cst_11 = arith.constant dense<0.000000e+00> : vector<16xf32>
    %17 = vector.multi_reduction <add>, %16, %cst_11 [1] : vector<16x32xf32> to vector<16xf32>
    %18 = vector.shape_cast %17 : vector<16xf32> to vector<16x1xf32>
    %cst_12 = arith.constant 3.200000e+01 : f32
    %19 = vector.broadcast %cst_12 : f32 to vector<16x1xf32>
    %20 = arith.divf %18, %19 : vector<16x1xf32>
    %cst_13 = arith.constant 9.99999974E-6 : f32
    %21 = vector.broadcast %cst_13 : f32 to vector<16x1xf32>
    %22 = arith.addf %20, %21 : vector<16x1xf32>
    %23 = math.rsqrt %22 : vector<16x1xf32>
    %24 = vector.broadcast %23 : vector<16x1xf32> to vector<16x32xf32>
    %25 = arith.mulf %13, %24 : vector<16x32xf32>
    %26 = vector.extract_strided_slice %15 {offsets = [0, 0], sizes = [32, 96], strides = [1, 1]} : vector<32x256xf32> to vector<32x96xf32>
    %cst_14 = arith.constant dense<0.000000e+00> : vector<16x96xf32>
    %27 = tpu.matmul %25, %26, %cst_14 {dimension_numbers = #tpu.dot_dimension_numbers<[1], [0], [0], [1], [0, 0, 1, 1], [], []>} : vector<16x32xf32>, vector<32x96xf32>, vector<16x96xf32> -> vector<16x96xf32>
    %28 = vector.extract_strided_slice %27 {offsets = [0, 0], sizes = [16, 32], strides = [1, 1]} : vector<16x96xf32> to vector<16x32xf32>
    %29 = arith.mulf %28, %1 : vector<16x32xf32>
    %cst_15 = arith.constant dense<0.000000e+00> : vector<16x32xf32>
    %30 = tpu.matmul %28, %5, %cst_15 {dimension_numbers = #tpu.dot_dimension_numbers<[1], [0], [0], [1], [0, 0, 1, 1], [], []>} : vector<16x32xf32>, vector<32x32xf32>, vector<16x32xf32> -> vector<16x32xf32>
    %31 = arith.mulf %30, %2 : vector<16x32xf32>
    %32 = arith.addf %29, %31 : vector<16x32xf32>
    %cst_16 = arith.constant 0.353553385 : f32
    %33 = vector.broadcast %cst_16 : f32 to vector<16x32xf32>
    %34 = arith.mulf %32, %33 : vector<16x32xf32>
    %35 = vector.extract_strided_slice %27 {offsets = [0, 32], sizes = [16, 32], strides = [1, 1]} : vector<16x96xf32> to vector<16x32xf32>
    %36 = arith.mulf %35, %1 : vector<16x32xf32>
    %cst_17 = arith.constant dense<0.000000e+00> : vector<16x32xf32>
    %37 = tpu.matmul %35, %5, %cst_17 {dimension_numbers = #tpu.dot_dimension_numbers<[1], [0], [0], [1], [0, 0, 1, 1], [], []>} : vector<16x32xf32>, vector<32x32xf32>, vector<16x32xf32> -> vector<16x32xf32>
    %38 = arith.mulf %37, %2 : vector<16x32xf32>
    %39 = arith.addf %36, %38 : vector<16x32xf32>
    %40 = vector.extract_strided_slice %27 {offsets = [0, 64], sizes = [16, 32], strides = [1, 1]} : vector<16x96xf32> to vector<16x32xf32>
    %cst_18 = arith.constant 0.000000e+00 : f32
    %41 = vector.broadcast %cst_18 : f32 to vector<16x32xf32>
    %42 = vector.extract_strided_slice %0 {offsets = [0, 80], sizes = [16, 32], strides = [1, 1]} : vector<16x208xf32> to vector<16x32xf32>
    %43 = arith.mulf %39, %42 : vector<16x32xf32>
    %44 = arith.mulf %40, %42 : vector<16x32xf32>
    %cst_19 = arith.constant dense<0.000000e+00> : vector<16x16xf32>
    %45 = tpu.matmul %34, %43, %cst_19 {dimension_numbers = #tpu.dot_dimension_numbers<[1], [1], [0], [0], [0, 0, 1, 0], [], []>} : vector<16x32xf32>, vector<16x32xf32>, vector<16x16xf32> -> vector<16x16xf32>
    %46 = arith.addf %45, %3 : vector<16x16xf32>
    %cst_20 = arith.constant dense<0xFF800000> : vector<16xf32>
    %47 = vector.multi_reduction <maximumf>, %46, %cst_20 [1] : vector<16x16xf32> to vector<16xf32>
    %48 = vector.shape_cast %47 : vector<16xf32> to vector<16x1xf32>
    %49 = vector.broadcast %48 : vector<16x1xf32> to vector<16x16xf32>
    %50 = arith.subf %46, %49 : vector<16x16xf32>
    %51 = math.exp %50 : vector<16x16xf32>
    %cst_21 = arith.constant dense<0.000000e+00> : vector<16xf32>
    %52 = vector.multi_reduction <add>, %51, %cst_21 [1] : vector<16x16xf32> to vector<16xf32>
    %53 = vector.shape_cast %52 : vector<16xf32> to vector<16x1xf32>
    %54 = tpu.reciprocal %53 {approx = true} : vector<16x1xf32> -> vector<16x1xf32>
    %55 = vector.broadcast %54 : vector<16x1xf32> to vector<16x16xf32>
    %56 = arith.mulf %51, %55 : vector<16x16xf32>
    %cst_22 = arith.constant dense<0.000000e+00> : vector<16x32xf32>
    %57 = tpu.matmul %56, %44, %cst_22 {dimension_numbers = #tpu.dot_dimension_numbers<[1], [0], [0], [1], [0, 0, 1, 1], [], []>} : vector<16x16xf32>, vector<16x32xf32>, vector<16x32xf32> -> vector<16x32xf32>
    %58 = arith.addf %41, %57 : vector<16x32xf32>
    %59 = vector.extract_strided_slice %0 {offsets = [0, 112], sizes = [16, 32], strides = [1, 1]} : vector<16x208xf32> to vector<16x32xf32>
    %60 = arith.mulf %39, %59 : vector<16x32xf32>
    %61 = arith.mulf %40, %59 : vector<16x32xf32>
    %cst_23 = arith.constant dense<0.000000e+00> : vector<16x16xf32>
    %62 = tpu.matmul %34, %60, %cst_23 {dimension_numbers = #tpu.dot_dimension_numbers<[1], [1], [0], [0], [0, 0, 1, 0], [], []>} : vector<16x32xf32>, vector<16x32xf32>, vector<16x16xf32> -> vector<16x16xf32>
    %63 = arith.addf %62, %3 : vector<16x16xf32>
    %cst_24 = arith.constant dense<0xFF800000> : vector<16xf32>
    %64 = vector.multi_reduction <maximumf>, %63, %cst_24 [1] : vector<16x16xf32> to vector<16xf32>
    %65 = vector.shape_cast %64 : vector<16xf32> to vector<16x1xf32>
    %66 = vector.broadcast %65 : vector<16x1xf32> to vector<16x16xf32>
    %67 = arith.subf %63, %66 : vector<16x16xf32>
    %68 = math.exp %67 : vector<16x16xf32>
    %cst_25 = arith.constant dense<0.000000e+00> : vector<16xf32>
    %69 = vector.multi_reduction <add>, %68, %cst_25 [1] : vector<16x16xf32> to vector<16xf32>
    %70 = vector.shape_cast %69 : vector<16xf32> to vector<16x1xf32>
    %71 = tpu.reciprocal %70 {approx = true} : vector<16x1xf32> -> vector<16x1xf32>
    %72 = vector.broadcast %71 : vector<16x1xf32> to vector<16x16xf32>
    %73 = arith.mulf %68, %72 : vector<16x16xf32>
    %cst_26 = arith.constant dense<0.000000e+00> : vector<16x32xf32>
    %74 = tpu.matmul %73, %61, %cst_26 {dimension_numbers = #tpu.dot_dimension_numbers<[1], [0], [0], [1], [0, 0, 1, 1], [], []>} : vector<16x16xf32>, vector<16x32xf32>, vector<16x32xf32> -> vector<16x32xf32>
    %75 = arith.addf %58, %74 : vector<16x32xf32>
    %76 = vector.extract_strided_slice %0 {offsets = [0, 144], sizes = [16, 32], strides = [1, 1]} : vector<16x208xf32> to vector<16x32xf32>
    %77 = arith.mulf %39, %76 : vector<16x32xf32>
    %78 = arith.mulf %40, %76 : vector<16x32xf32>
    %cst_27 = arith.constant dense<0.000000e+00> : vector<16x16xf32>
    %79 = tpu.matmul %34, %77, %cst_27 {dimension_numbers = #tpu.dot_dimension_numbers<[1], [1], [0], [0], [0, 0, 1, 0], [], []>} : vector<16x32xf32>, vector<16x32xf32>, vector<16x16xf32> -> vector<16x16xf32>
    %80 = arith.addf %79, %3 : vector<16x16xf32>
    %cst_28 = arith.constant dense<0xFF800000> : vector<16xf32>
    %81 = vector.multi_reduction <maximumf>, %80, %cst_28 [1] : vector<16x16xf32> to vector<16xf32>
    %82 = vector.shape_cast %81 : vector<16xf32> to vector<16x1xf32>
    %83 = vector.broadcast %82 : vector<16x1xf32> to vector<16x16xf32>
    %84 = arith.subf %80, %83 : vector<16x16xf32>
    %85 = math.exp %84 : vector<16x16xf32>
    %cst_29 = arith.constant dense<0.000000e+00> : vector<16xf32>
    %86 = vector.multi_reduction <add>, %85, %cst_29 [1] : vector<16x16xf32> to vector<16xf32>
    %87 = vector.shape_cast %86 : vector<16xf32> to vector<16x1xf32>
    %88 = tpu.reciprocal %87 {approx = true} : vector<16x1xf32> -> vector<16x1xf32>
    %89 = vector.broadcast %88 : vector<16x1xf32> to vector<16x16xf32>
    %90 = arith.mulf %85, %89 : vector<16x16xf32>
    %cst_30 = arith.constant dense<0.000000e+00> : vector<16x32xf32>
    %91 = tpu.matmul %90, %78, %cst_30 {dimension_numbers = #tpu.dot_dimension_numbers<[1], [0], [0], [1], [0, 0, 1, 1], [], []>} : vector<16x16xf32>, vector<16x32xf32>, vector<16x32xf32> -> vector<16x32xf32>
    %92 = arith.addf %75, %91 : vector<16x32xf32>
    %93 = vector.extract_strided_slice %0 {offsets = [0, 176], sizes = [16, 32], strides = [1, 1]} : vector<16x208xf32> to vector<16x32xf32>
    %94 = arith.mulf %39, %93 : vector<16x32xf32>
    %95 = arith.mulf %40, %93 : vector<16x32xf32>
    %cst_31 = arith.constant dense<0.000000e+00> : vector<16x16xf32>
    %96 = tpu.matmul %34, %94, %cst_31 {dimension_numbers = #tpu.dot_dimension_numbers<[1], [1], [0], [0], [0, 0, 1, 0], [], []>} : vector<16x32xf32>, vector<16x32xf32>, vector<16x16xf32> -> vector<16x16xf32>
    %97 = arith.addf %96, %3 : vector<16x16xf32>
    %cst_32 = arith.constant dense<0xFF800000> : vector<16xf32>
    %98 = vector.multi_reduction <maximumf>, %97, %cst_32 [1] : vector<16x16xf32> to vector<16xf32>
    %99 = vector.shape_cast %98 : vector<16xf32> to vector<16x1xf32>
    %100 = vector.broadcast %99 : vector<16x1xf32> to vector<16x16xf32>
    %101 = arith.subf %97, %100 : vector<16x16xf32>
    %102 = math.exp %101 : vector<16x16xf32>
    %cst_33 = arith.constant dense<0.000000e+00> : vector<16xf32>
    %103 = vector.multi_reduction <add>, %102, %cst_33 [1] : vector<16x16xf32> to vector<16xf32>
    %104 = vector.shape_cast %103 : vector<16xf32> to vector<16x1xf32>
    %105 = tpu.reciprocal %104 {approx = true} : vector<16x1xf32> -> vector<16x1xf32>
    %106 = vector.broadcast %105 : vector<16x1xf32> to vector<16x16xf32>
    %107 = arith.mulf %102, %106 : vector<16x16xf32>
    %cst_34 = arith.constant dense<0.000000e+00> : vector<16x32xf32>
    %108 = tpu.matmul %107, %95, %cst_34 {dimension_numbers = #tpu.dot_dimension_numbers<[1], [0], [0], [1], [0, 0, 1, 1], [], []>} : vector<16x16xf32>, vector<16x32xf32>, vector<16x32xf32> -> vector<16x32xf32>
    %109 = arith.addf %92, %108 : vector<16x32xf32>
    %110 = vector.extract_strided_slice %15 {offsets = [0, 96], sizes = [32, 32], strides = [1, 1]} : vector<32x256xf32> to vector<32x32xf32>
    %cst_35 = arith.constant dense<0.000000e+00> : vector<16x32xf32>
    %111 = tpu.matmul %109, %110, %cst_35 {dimension_numbers = #tpu.dot_dimension_numbers<[1], [0], [0], [1], [0, 0, 1, 1], [], []>} : vector<16x32xf32>, vector<32x32xf32>, vector<16x32xf32> -> vector<16x32xf32>
    %112 = arith.addf %13, %111 : vector<16x32xf32>
    %113 = arith.mulf %112, %112 : vector<16x32xf32>
    %cst_36 = arith.constant dense<0.000000e+00> : vector<16xf32>
    %114 = vector.multi_reduction <add>, %113, %cst_36 [1] : vector<16x32xf32> to vector<16xf32>
    %115 = vector.shape_cast %114 : vector<16xf32> to vector<16x1xf32>
    %cst_37 = arith.constant 3.200000e+01 : f32
    %116 = vector.broadcast %cst_37 : f32 to vector<16x1xf32>
    %117 = arith.divf %115, %116 : vector<16x1xf32>
    %cst_38 = arith.constant 9.99999974E-6 : f32
    %118 = vector.broadcast %cst_38 : f32 to vector<16x1xf32>
    %119 = arith.addf %117, %118 : vector<16x1xf32>
    %120 = math.rsqrt %119 : vector<16x1xf32>
    %121 = vector.broadcast %120 : vector<16x1xf32> to vector<16x32xf32>
    %122 = arith.mulf %112, %121 : vector<16x32xf32>
    %123 = vector.extract_strided_slice %15 {offsets = [0, 128], sizes = [32, 128], strides = [1, 1]} : vector<32x256xf32> to vector<32x128xf32>
    %cst_39 = arith.constant dense<0.000000e+00> : vector<16x128xf32>
    %124 = tpu.matmul %122, %123, %cst_39 {dimension_numbers = #tpu.dot_dimension_numbers<[1], [0], [0], [1], [0, 0, 1, 1], [], []>} : vector<16x32xf32>, vector<32x128xf32>, vector<16x128xf32> -> vector<16x128xf32>
    %125 = vector.extract_strided_slice %124 {offsets = [0, 0], sizes = [16, 64], strides = [1, 1]} : vector<16x128xf32> to vector<16x64xf32>
    %126 = vector.extract_strided_slice %124 {offsets = [0, 64], sizes = [16, 64], strides = [1, 1]} : vector<16x128xf32> to vector<16x64xf32>
    %cst_40 = arith.constant 0.000000e+00 : f32
    %127 = vector.broadcast %cst_40 : f32 to vector<16x64xf32>
    %128 = arith.subf %127, %125 : vector<16x64xf32>
    %129 = math.exp %128 : vector<16x64xf32>
    %cst_41 = arith.constant 1.000000e+00 : f32
    %130 = vector.broadcast %cst_41 : f32 to vector<16x64xf32>
    %131 = arith.addf %130, %129 : vector<16x64xf32>
    %132 = tpu.reciprocal %131 {approx = true} : vector<16x64xf32> -> vector<16x64xf32>
    %133 = arith.mulf %125, %132 : vector<16x64xf32>
    %134 = arith.mulf %133, %126 : vector<16x64xf32>
    %c0_42 = arith.constant 0 : index
    %c0_43 = arith.constant 0 : index
    %c0_44 = arith.constant 0 : index
    %135 = vector.load %arg5[%c0_42, %c0_43, %c0_44] : memref<2x64x32xf32, #tpu.memory_space<vmem>>, vector<1x64x32xf32>
    %136 = vector.shape_cast %135 : vector<1x64x32xf32> to vector<64x32xf32>
    %cst_45 = arith.constant dense<0.000000e+00> : vector<16x32xf32>
    %137 = tpu.matmul %134, %136, %cst_45 {dimension_numbers = #tpu.dot_dimension_numbers<[1], [0], [0], [1], [0, 0, 1, 1], [], []>} : vector<16x64xf32>, vector<64x32xf32>, vector<16x32xf32> -> vector<16x32xf32>
    %138 = arith.addf %112, %137 : vector<16x32xf32>
    %c1 = arith.constant 1 : index
    %c0_46 = arith.constant 0 : index
    %c0_47 = arith.constant 0 : index
    %139 = vector.load %arg4[%c1, %c0_46, %c0_47] : memref<2x32x256xf32, #tpu.memory_space<vmem>>, vector<1x32x256xf32>
    %140 = vector.shape_cast %139 : vector<1x32x256xf32> to vector<32x256xf32>
    %141 = arith.mulf %138, %138 : vector<16x32xf32>
    %cst_48 = arith.constant dense<0.000000e+00> : vector<16xf32>
    %142 = vector.multi_reduction <add>, %141, %cst_48 [1] : vector<16x32xf32> to vector<16xf32>
    %143 = vector.shape_cast %142 : vector<16xf32> to vector<16x1xf32>
    %cst_49 = arith.constant 3.200000e+01 : f32
    %144 = vector.broadcast %cst_49 : f32 to vector<16x1xf32>
    %145 = arith.divf %143, %144 : vector<16x1xf32>
    %cst_50 = arith.constant 9.99999974E-6 : f32
    %146 = vector.broadcast %cst_50 : f32 to vector<16x1xf32>
    %147 = arith.addf %145, %146 : vector<16x1xf32>
    %148 = math.rsqrt %147 : vector<16x1xf32>
    %149 = vector.broadcast %148 : vector<16x1xf32> to vector<16x32xf32>
    %150 = arith.mulf %138, %149 : vector<16x32xf32>
    %151 = vector.extract_strided_slice %140 {offsets = [0, 0], sizes = [32, 96], strides = [1, 1]} : vector<32x256xf32> to vector<32x96xf32>
    %cst_51 = arith.constant dense<0.000000e+00> : vector<16x96xf32>
    %152 = tpu.matmul %150, %151, %cst_51 {dimension_numbers = #tpu.dot_dimension_numbers<[1], [0], [0], [1], [0, 0, 1, 1], [], []>} : vector<16x32xf32>, vector<32x96xf32>, vector<16x96xf32> -> vector<16x96xf32>
    %153 = vector.extract_strided_slice %152 {offsets = [0, 0], sizes = [16, 32], strides = [1, 1]} : vector<16x96xf32> to vector<16x32xf32>
    %154 = arith.mulf %153, %1 : vector<16x32xf32>
    %cst_52 = arith.constant dense<0.000000e+00> : vector<16x32xf32>
    %155 = tpu.matmul %153, %5, %cst_52 {dimension_numbers = #tpu.dot_dimension_numbers<[1], [0], [0], [1], [0, 0, 1, 1], [], []>} : vector<16x32xf32>, vector<32x32xf32>, vector<16x32xf32> -> vector<16x32xf32>
    %156 = arith.mulf %155, %2 : vector<16x32xf32>
    %157 = arith.addf %154, %156 : vector<16x32xf32>
    %cst_53 = arith.constant 0.353553385 : f32
    %158 = vector.broadcast %cst_53 : f32 to vector<16x32xf32>
    %159 = arith.mulf %157, %158 : vector<16x32xf32>
    %160 = vector.extract_strided_slice %152 {offsets = [0, 32], sizes = [16, 32], strides = [1, 1]} : vector<16x96xf32> to vector<16x32xf32>
    %161 = arith.mulf %160, %1 : vector<16x32xf32>
    %cst_54 = arith.constant dense<0.000000e+00> : vector<16x32xf32>
    %162 = tpu.matmul %160, %5, %cst_54 {dimension_numbers = #tpu.dot_dimension_numbers<[1], [0], [0], [1], [0, 0, 1, 1], [], []>} : vector<16x32xf32>, vector<32x32xf32>, vector<16x32xf32> -> vector<16x32xf32>
    %163 = arith.mulf %162, %2 : vector<16x32xf32>
    %164 = arith.addf %161, %163 : vector<16x32xf32>
    %165 = vector.extract_strided_slice %152 {offsets = [0, 64], sizes = [16, 32], strides = [1, 1]} : vector<16x96xf32> to vector<16x32xf32>
    %cst_55 = arith.constant 0.000000e+00 : f32
    %166 = vector.broadcast %cst_55 : f32 to vector<16x32xf32>
    %167 = vector.extract_strided_slice %0 {offsets = [0, 80], sizes = [16, 32], strides = [1, 1]} : vector<16x208xf32> to vector<16x32xf32>
    %168 = arith.mulf %164, %167 : vector<16x32xf32>
    %169 = arith.mulf %165, %167 : vector<16x32xf32>
    %cst_56 = arith.constant dense<0.000000e+00> : vector<16x16xf32>
    %170 = tpu.matmul %159, %168, %cst_56 {dimension_numbers = #tpu.dot_dimension_numbers<[1], [1], [0], [0], [0, 0, 1, 0], [], []>} : vector<16x32xf32>, vector<16x32xf32>, vector<16x16xf32> -> vector<16x16xf32>
    %171 = arith.addf %170, %3 : vector<16x16xf32>
    %cst_57 = arith.constant dense<0xFF800000> : vector<16xf32>
    %172 = vector.multi_reduction <maximumf>, %171, %cst_57 [1] : vector<16x16xf32> to vector<16xf32>
    %173 = vector.shape_cast %172 : vector<16xf32> to vector<16x1xf32>
    %174 = vector.broadcast %173 : vector<16x1xf32> to vector<16x16xf32>
    %175 = arith.subf %171, %174 : vector<16x16xf32>
    %176 = math.exp %175 : vector<16x16xf32>
    %cst_58 = arith.constant dense<0.000000e+00> : vector<16xf32>
    %177 = vector.multi_reduction <add>, %176, %cst_58 [1] : vector<16x16xf32> to vector<16xf32>
    %178 = vector.shape_cast %177 : vector<16xf32> to vector<16x1xf32>
    %179 = tpu.reciprocal %178 {approx = true} : vector<16x1xf32> -> vector<16x1xf32>
    %180 = vector.broadcast %179 : vector<16x1xf32> to vector<16x16xf32>
    %181 = arith.mulf %176, %180 : vector<16x16xf32>
    %cst_59 = arith.constant dense<0.000000e+00> : vector<16x32xf32>
    %182 = tpu.matmul %181, %169, %cst_59 {dimension_numbers = #tpu.dot_dimension_numbers<[1], [0], [0], [1], [0, 0, 1, 1], [], []>} : vector<16x16xf32>, vector<16x32xf32>, vector<16x32xf32> -> vector<16x32xf32>
    %183 = arith.addf %166, %182 : vector<16x32xf32>
    %184 = vector.extract_strided_slice %0 {offsets = [0, 112], sizes = [16, 32], strides = [1, 1]} : vector<16x208xf32> to vector<16x32xf32>
    %185 = arith.mulf %164, %184 : vector<16x32xf32>
    %186 = arith.mulf %165, %184 : vector<16x32xf32>
    %cst_60 = arith.constant dense<0.000000e+00> : vector<16x16xf32>
    %187 = tpu.matmul %159, %185, %cst_60 {dimension_numbers = #tpu.dot_dimension_numbers<[1], [1], [0], [0], [0, 0, 1, 0], [], []>} : vector<16x32xf32>, vector<16x32xf32>, vector<16x16xf32> -> vector<16x16xf32>
    %188 = arith.addf %187, %3 : vector<16x16xf32>
    %cst_61 = arith.constant dense<0xFF800000> : vector<16xf32>
    %189 = vector.multi_reduction <maximumf>, %188, %cst_61 [1] : vector<16x16xf32> to vector<16xf32>
    %190 = vector.shape_cast %189 : vector<16xf32> to vector<16x1xf32>
    %191 = vector.broadcast %190 : vector<16x1xf32> to vector<16x16xf32>
    %192 = arith.subf %188, %191 : vector<16x16xf32>
    %193 = math.exp %192 : vector<16x16xf32>
    %cst_62 = arith.constant dense<0.000000e+00> : vector<16xf32>
    %194 = vector.multi_reduction <add>, %193, %cst_62 [1] : vector<16x16xf32> to vector<16xf32>
    %195 = vector.shape_cast %194 : vector<16xf32> to vector<16x1xf32>
    %196 = tpu.reciprocal %195 {approx = true} : vector<16x1xf32> -> vector<16x1xf32>
    %197 = vector.broadcast %196 : vector<16x1xf32> to vector<16x16xf32>
    %198 = arith.mulf %193, %197 : vector<16x16xf32>
    %cst_63 = arith.constant dense<0.000000e+00> : vector<16x32xf32>
    %199 = tpu.matmul %198, %186, %cst_63 {dimension_numbers = #tpu.dot_dimension_numbers<[1], [0], [0], [1], [0, 0, 1, 1], [], []>} : vector<16x16xf32>, vector<16x32xf32>, vector<16x32xf32> -> vector<16x32xf32>
    %200 = arith.addf %183, %199 : vector<16x32xf32>
    %201 = vector.extract_strided_slice %0 {offsets = [0, 144], sizes = [16, 32], strides = [1, 1]} : vector<16x208xf32> to vector<16x32xf32>
    %202 = arith.mulf %164, %201 : vector<16x32xf32>
    %203 = arith.mulf %165, %201 : vector<16x32xf32>
    %cst_64 = arith.constant dense<0.000000e+00> : vector<16x16xf32>
    %204 = tpu.matmul %159, %202, %cst_64 {dimension_numbers = #tpu.dot_dimension_numbers<[1], [1], [0], [0], [0, 0, 1, 0], [], []>} : vector<16x32xf32>, vector<16x32xf32>, vector<16x16xf32> -> vector<16x16xf32>
    %205 = arith.addf %204, %3 : vector<16x16xf32>
    %cst_65 = arith.constant dense<0xFF800000> : vector<16xf32>
    %206 = vector.multi_reduction <maximumf>, %205, %cst_65 [1] : vector<16x16xf32> to vector<16xf32>
    %207 = vector.shape_cast %206 : vector<16xf32> to vector<16x1xf32>
    %208 = vector.broadcast %207 : vector<16x1xf32> to vector<16x16xf32>
    %209 = arith.subf %205, %208 : vector<16x16xf32>
    %210 = math.exp %209 : vector<16x16xf32>
    %cst_66 = arith.constant dense<0.000000e+00> : vector<16xf32>
    %211 = vector.multi_reduction <add>, %210, %cst_66 [1] : vector<16x16xf32> to vector<16xf32>
    %212 = vector.shape_cast %211 : vector<16xf32> to vector<16x1xf32>
    %213 = tpu.reciprocal %212 {approx = true} : vector<16x1xf32> -> vector<16x1xf32>
    %214 = vector.broadcast %213 : vector<16x1xf32> to vector<16x16xf32>
    %215 = arith.mulf %210, %214 : vector<16x16xf32>
    %cst_67 = arith.constant dense<0.000000e+00> : vector<16x32xf32>
    %216 = tpu.matmul %215, %203, %cst_67 {dimension_numbers = #tpu.dot_dimension_numbers<[1], [0], [0], [1], [0, 0, 1, 1], [], []>} : vector<16x16xf32>, vector<16x32xf32>, vector<16x32xf32> -> vector<16x32xf32>
    %217 = arith.addf %200, %216 : vector<16x32xf32>
    %218 = vector.extract_strided_slice %0 {offsets = [0, 176], sizes = [16, 32], strides = [1, 1]} : vector<16x208xf32> to vector<16x32xf32>
    %219 = arith.mulf %164, %218 : vector<16x32xf32>
    %220 = arith.mulf %165, %218 : vector<16x32xf32>
    %cst_68 = arith.constant dense<0.000000e+00> : vector<16x16xf32>
    %221 = tpu.matmul %159, %219, %cst_68 {dimension_numbers = #tpu.dot_dimension_numbers<[1], [1], [0], [0], [0, 0, 1, 0], [], []>} : vector<16x32xf32>, vector<16x32xf32>, vector<16x16xf32> -> vector<16x16xf32>
    %222 = arith.addf %221, %3 : vector<16x16xf32>
    %cst_69 = arith.constant dense<0xFF800000> : vector<16xf32>
    %223 = vector.multi_reduction <maximumf>, %222, %cst_69 [1] : vector<16x16xf32> to vector<16xf32>
    %224 = vector.shape_cast %223 : vector<16xf32> to vector<16x1xf32>
    %225 = vector.broadcast %224 : vector<16x1xf32> to vector<16x16xf32>
    %226 = arith.subf %222, %225 : vector<16x16xf32>
    %227 = math.exp %226 : vector<16x16xf32>
    %cst_70 = arith.constant dense<0.000000e+00> : vector<16xf32>
    %228 = vector.multi_reduction <add>, %227, %cst_70 [1] : vector<16x16xf32> to vector<16xf32>
    %229 = vector.shape_cast %228 : vector<16xf32> to vector<16x1xf32>
    %230 = tpu.reciprocal %229 {approx = true} : vector<16x1xf32> -> vector<16x1xf32>
    %231 = vector.broadcast %230 : vector<16x1xf32> to vector<16x16xf32>
    %232 = arith.mulf %227, %231 : vector<16x16xf32>
    %cst_71 = arith.constant dense<0.000000e+00> : vector<16x32xf32>
    %233 = tpu.matmul %232, %220, %cst_71 {dimension_numbers = #tpu.dot_dimension_numbers<[1], [0], [0], [1], [0, 0, 1, 1], [], []>} : vector<16x16xf32>, vector<16x32xf32>, vector<16x32xf32> -> vector<16x32xf32>
    %234 = arith.addf %217, %233 : vector<16x32xf32>
    %235 = vector.extract_strided_slice %140 {offsets = [0, 96], sizes = [32, 32], strides = [1, 1]} : vector<32x256xf32> to vector<32x32xf32>
    %cst_72 = arith.constant dense<0.000000e+00> : vector<16x32xf32>
    %236 = tpu.matmul %234, %235, %cst_72 {dimension_numbers = #tpu.dot_dimension_numbers<[1], [0], [0], [1], [0, 0, 1, 1], [], []>} : vector<16x32xf32>, vector<32x32xf32>, vector<16x32xf32> -> vector<16x32xf32>
    %237 = arith.addf %138, %236 : vector<16x32xf32>
    %238 = arith.mulf %237, %237 : vector<16x32xf32>
    %cst_73 = arith.constant dense<0.000000e+00> : vector<16xf32>
    %239 = vector.multi_reduction <add>, %238, %cst_73 [1] : vector<16x32xf32> to vector<16xf32>
    %240 = vector.shape_cast %239 : vector<16xf32> to vector<16x1xf32>
    %cst_74 = arith.constant 3.200000e+01 : f32
    %241 = vector.broadcast %cst_74 : f32 to vector<16x1xf32>
    %242 = arith.divf %240, %241 : vector<16x1xf32>
    %cst_75 = arith.constant 9.99999974E-6 : f32
    %243 = vector.broadcast %cst_75 : f32 to vector<16x1xf32>
    %244 = arith.addf %242, %243 : vector<16x1xf32>
    %245 = math.rsqrt %244 : vector<16x1xf32>
    %246 = vector.broadcast %245 : vector<16x1xf32> to vector<16x32xf32>
    %247 = arith.mulf %237, %246 : vector<16x32xf32>
    %248 = vector.extract_strided_slice %140 {offsets = [0, 128], sizes = [32, 128], strides = [1, 1]} : vector<32x256xf32> to vector<32x128xf32>
    %cst_76 = arith.constant dense<0.000000e+00> : vector<16x128xf32>
    %249 = tpu.matmul %247, %248, %cst_76 {dimension_numbers = #tpu.dot_dimension_numbers<[1], [0], [0], [1], [0, 0, 1, 1], [], []>} : vector<16x32xf32>, vector<32x128xf32>, vector<16x128xf32> -> vector<16x128xf32>
    %250 = vector.extract_strided_slice %249 {offsets = [0, 0], sizes = [16, 64], strides = [1, 1]} : vector<16x128xf32> to vector<16x64xf32>
    %251 = vector.extract_strided_slice %249 {offsets = [0, 64], sizes = [16, 64], strides = [1, 1]} : vector<16x128xf32> to vector<16x64xf32>
    %cst_77 = arith.constant 0.000000e+00 : f32
    %252 = vector.broadcast %cst_77 : f32 to vector<16x64xf32>
    %253 = arith.subf %252, %250 : vector<16x64xf32>
    %254 = math.exp %253 : vector<16x64xf32>
    %cst_78 = arith.constant 1.000000e+00 : f32
    %255 = vector.broadcast %cst_78 : f32 to vector<16x64xf32>
    %256 = arith.addf %255, %254 : vector<16x64xf32>
    %257 = tpu.reciprocal %256 {approx = true} : vector<16x64xf32> -> vector<16x64xf32>
    %258 = arith.mulf %250, %257 : vector<16x64xf32>
    %259 = arith.mulf %258, %251 : vector<16x64xf32>
    %c1_79 = arith.constant 1 : index
    %c0_80 = arith.constant 0 : index
    %c0_81 = arith.constant 0 : index
    %260 = vector.load %arg5[%c1_79, %c0_80, %c0_81] : memref<2x64x32xf32, #tpu.memory_space<vmem>>, vector<1x64x32xf32>
    %261 = vector.shape_cast %260 : vector<1x64x32xf32> to vector<64x32xf32>
    %cst_82 = arith.constant dense<0.000000e+00> : vector<16x32xf32>
    %262 = tpu.matmul %259, %261, %cst_82 {dimension_numbers = #tpu.dot_dimension_numbers<[1], [0], [0], [1], [0, 0, 1, 1], [], []>} : vector<16x64xf32>, vector<64x32xf32>, vector<16x32xf32> -> vector<16x32xf32>
    %263 = arith.addf %237, %262 : vector<16x32xf32>
    %264 = arith.mulf %263, %263 : vector<16x32xf32>
    %cst_83 = arith.constant dense<0.000000e+00> : vector<16xf32>
    %265 = vector.multi_reduction <add>, %264, %cst_83 [1] : vector<16x32xf32> to vector<16xf32>
    %266 = vector.shape_cast %265 : vector<16xf32> to vector<16x1xf32>
    %cst_84 = arith.constant 3.200000e+01 : f32
    %267 = vector.broadcast %cst_84 : f32 to vector<16x1xf32>
    %268 = arith.divf %266, %267 : vector<16x1xf32>
    %cst_85 = arith.constant 9.99999974E-6 : f32
    %269 = vector.broadcast %cst_85 : f32 to vector<16x1xf32>
    %270 = arith.addf %268, %269 : vector<16x1xf32>
    %271 = math.rsqrt %270 : vector<16x1xf32>
    %272 = vector.broadcast %271 : vector<16x1xf32> to vector<16x32xf32>
    %273 = arith.mulf %263, %272 : vector<16x32xf32>
    %c0_86 = arith.constant 0 : index
    %c0_87 = arith.constant 0 : index
    %274 = vector.load %arg3[%c0_86, %c0_87] : memref<32x128xf32, #tpu.memory_space<vmem>>, vector<32x128xf32>
    %cst_88 = arith.constant dense<0.000000e+00> : vector<16x128xf32>
    %275 = tpu.matmul %273, %274, %cst_88 {dimension_numbers = #tpu.dot_dimension_numbers<[1], [0], [0], [1], [0, 0, 1, 1], [], []>} : vector<16x32xf32>, vector<32x128xf32>, vector<16x128xf32> -> vector<16x128xf32>
    %c0_89 = arith.constant 0 : index
    %c0_90 = arith.constant 0 : index
    %276 = vector.load %arg6[%c0_89, %c0_90] : memref<16x128xf32, #tpu.memory_space<vmem>>, vector<16x128xf32>
    tpu.vector_store %arg6[%c0_89, %c0_90], %275 {strides = array<i32>} : memref<16x128xf32, #tpu.memory_space<vmem>>, vector<16x128xf32>,
    return
  }
}

</mosaic_0001>

<bundles_post_ra>
// kernel: _forward.1
= control target key start
LH: loop header
LB: loop body
LE: loop exit
PB: predicated region body
PF: predicated region fallthrough
CT: control target
= control target key end

     0   :  { %v1944_v0 = vmov 0   ;;  %v41_v11 = vlaneseq  ;;  %vm53_vm0 = vcmask 523264   ;;  %v1945_v14 = vmov 0.0   ;;  %s1947_s18 = smov 96   ;;  %s1948_s25 = smov 48   ;;  %s2707_s0 = inlined_call_operand.vmem [shape: s32[16,1], index: 0, kind: input, shape index: {}]   ;;  %s2708_s2 = inlined_call_operand.vmem [shape: f32[96,32], index: 2, kind: input, shape index: {}]   ;;  %s2709_s1 = inlined_call_operand.vmem [shape: f32[16,208], index: 1, kind: input, shape index: {}]   ;;  %s2710_s4 = inlined_call_operand.vmem [shape: f32[2,32,256], index: 4, kind: input, shape index: {}]   ;;  %s2711_s5 = inlined_call_operand.vmem [shape: f32[2,64,32], index: 5, kind: input, shape index: {}]   ;;  %s2712_s3 = inlined_call_operand.vmem [shape: f32[32,128], index: 3, kind: input, shape index: {}]   ;;  %s2713_s6 = inlined_call_operand.vmem [shape: f32[16,128], index: 6, kind: output, shape index: {}]  }
   0x1   :  { %1779 = vset.pattern.permute.xlu0 %v1944_v0  ;;  %v39_v1 = vld [vmem:[%s2707_s0] sm:$0xff]  ;;  %v34_v2 = vld [vmem:[%s2708_s2 + $0x38] sm:$0xff]  ;;  %v33_v3 = vld [vmem:[%s2708_s2 + $0x30] sm:$0xff]  ;;  %vm93_vm3 = vcmask 261120   ;;  %v1946_v24 = vmov 32.0   ;;  %s1949_s30 = smov 64  }
   0x2   :  { %44 = vperm.xlu0 %1779, %v39_v1   ;;  %68 = vmatpush.msra.mxu0 %v34_v2  ;;  %v32_v4 = vld [vmem:[%s2708_s2 + $0x28] sm:$0xff]  ;;  %v31_v5 = vld [vmem:[%s2708_s2 + $0x20] sm:$0xff]  ;;  %v30_v7 = vld [vmem:[%s2708_s2 + $0x18] sm:$0xff]  ;;  %v42_v12 = vand.u32 127, %v41_v11  ;;  %1840 = vrcp.f32 %v1946_v24  ;;  %s1950_s9 = smov 16   ;;  %vm352_vm11 = vcmask 392192  }
   0x3   :  { %v40_v6 = vld [vmem:[%s2707_s0 + $0x8] sm:$0xff]  ;;  %v29_v8 = vld [vmem:[%s2708_s2 + $0x10] sm:$0xff]  ;;  %v27_v10 = vld [vmem:[%s2708_s2] sm:$0xff]  ;;  %s1952_s20 = smov 80   ;;  %s1953_s21 = smov 112   ;;  %vm319_vm12 = vcmask 130048  }
   0x4   :  { %69 = vmatpush.msra.mxu0 %v33_v3  ;;  %v28_v9 = vld [vmem:[%s2708_s2 + $0x8] sm:$0xff]  ;;  %v2034_v26 = vld [vmem:[%s2709_s1] sm:$0xff]  ;;  %v2041_v28 = vld [vmem:[%s2710_s4 + $0x30] sm:$0xff]  ;;  %vm363_vm13 = vcmask 654336  }
   0x5   :  { %151 = vmatpush.msra.mxu1 %v2041_v28  ;;  %1765 = vmatpush.msra.mxu3 %v2041_v28  ;;  %v2048_v30 = vld [vmem:[%s2710_s4 + $0x20] sm:$0xff]  ;;  %v2053_v31 = vld [vmem:[%s2709_s1 + $0x8] sm:$0xff]  ;;  %v2061_v32 = vld [vmem:[%s2710_s4 + $0x10] sm:$0xff] }
   0x6   :  { %70 = vmatpush.msra.mxu0 %v32_v4  ;;  %v2068_v34 = vld [vmem:[%s2710_s4] sm:$0xff]  ;;  %v2081_v39 = vld [vmem:[%s2709_s1 + $0x10] sm:$0xff]  ;;  %v2090_v41 = vld [vmem:[%s2709_s1 + $0x18] sm:$0xff] }
   0x7   :  { %152 = vmatpush.msra.mxu1 %v2048_v30  ;;  %1766 = vmatpush.msra.mxu3 %v2048_v30  ;;  %v2102_v61 = vld [vmem:[%s2708_s2 + $0x58] sm:$0xff]  ;;  %v2107_v62 = vld [vmem:[%s2708_s2 + $0x50] sm:$0xff]  ;;  %v2114_v63 = vld [vmem:[%s2708_s2 + $0x48] sm:$0xff] }
   0x8   :  { %71 = vmatpush.msra.mxu0 %v31_v5  ;;  %v1841_v25 = vpop.eup %1840  ;;  %182 = vmatpush.msra.mxu2 %v2102_v61  ;;  %v2123_v0 = vld [vmem:[%s2708_s2 + $0x40] sm:$0xff]  ;;  %s1951_s2 = smov 32  }
   0x9   :  { %v101_v27 = vmul.f32 32.0, %v1841_v25  ;;  %153 = vmatpush.msra.mxu1 %v2061_v32  ;;  %1767 = vmatpush.msra.mxu3 %v2061_v32  ;;  %vm105_vm4 = vweird.f32 %v1841_v25 }
   0xa   :  { %47 = vperm.xlu0 %1779, %v40_v6   ;;  %72 = vmatpush.msra.mxu0 %v30_v7 }
   0xb   :  { %v102_v29 = vsub.f32 1.0, %v101_v27  ;;  %154 = vmatpush.msra.mxu1 %v2068_v34  ;;  %1768 = vmatpush.msra.mxu3 %v2068_v34 }
   0xc   :  { %73 = vmatpush.msra.mxu0 %v29_v8  ;;  %183 = vmatpush.msra.mxu2 %v2107_v62 }
   0xd   :  { %v103_v33 = vmul.f32 %v1841_v25, %v102_v29  ;;  %235 = vmatpush.msrb.mxu3 %v2102_v61 }
   0xe   :  { %74 = vmatpush.msra.mxu0 %v28_v9  ;;  %184 = vmatpush.msra.mxu2 %v2114_v63 }
   0xf   :  { %v104_v35 = vadd.f32 %v1841_v25, %v103_v33  ;;  %236 = vmatpush.msrb.mxu3 %v2107_v62 }
  0x10   :  { %75 = vmatpush.msra.mxu0 %v27_v10  ;;  %185 = vmatpush.msra.mxu2 %v2123_v0 }
  0x11   :  { %v2075_v36 = vsel %vm105_vm4, %v1841_v25, %v104_v35  ;;  %237 = vmatpush.msrb.mxu3 %v2114_v63 }
  0x12   :  { %197 = vrot.lane.b32.xlu0 %v2081_v39, %s1947_s18 }
  0x13   :  { %238 = vmatpush.msrb.mxu3 %v2123_v0 }
  0x1a   :  { %350 = vrot.lane.b32.xlu0 %v2090_v41, %s1948_s25 }
  0x74   :  { %v45_v13 = vpop.permute.xlu0 %44 }
  0x75   :  { %vm49_vm1 = vcmp.eq.s32.totalorder %v45_v13, %v42_v12 }
  0x76   :  { %v51_v15 = vsel %vm49_vm1, 1.0, %v1945_v14 }
  0x77   :  { %1673 = vmatmul.msk.f32.vlgmr.msra.gmra.mxu0 %vm53_vm0, %v51_v15 }
  0x7c   :  { %v48_v16 = vpop.permute.xlu0 %47 }
  0x7d   :  { %vm50_vm2 = vcmp.eq.s32.totalorder %v48_v16, %v42_v12 }
  0x7e   :  { %v52_v17 = vsel %vm50_vm2, 1.0, %v1945_v14 }
  0x7f   :  { %1674 = vmatmul.msk.f32.gmra.mxu0 %vm53_vm0, %v52_v17 }
  0x84   :  { %v2149_v6 = vpop.permute.xlu0 %197 }
  0x8c   :  { %v2159_v13 = vpop.permute.xlu0 %350 }
  0xf4   :  { %v2021_v18 = vpop.f32.mrf.mxu0 }
  0xf5   :  { %v91_v19 = vmul.f32 %v2021_v18, %v2021_v18 }
  0xf7   :  { %v94_v20 = vsel %vm93_vm3, %v91_v19, 0.0 }
  0xf8   :  { %95 = vadd.xlane.f32.xlu1 %v94_v20 }
  0xfc   :  { %v2026_v21 = vpop.f32.mrf.mxu0 }
  0xfd   :  { %v92_v22 = vmul.f32 %v2026_v21, %v2026_v21 }
  0xff   :  { %v97_v23 = vsel %vm93_vm3, %v92_v22, 0.0 }
 0x100   :  { %98 = vadd.xlane.f32.xlu1 %v97_v23 }
 0x119   :  { %195 = vrot.lane.b32.xlu1 %v2034_v26, %s1947_s18 }
 0x121   :  { %346 = vrot.lane.b32.xlu1 %v2053_v31, %s1948_s25 }
 0x129   :  { %280 = vrot.lane.b32.xlu1 %v2034_v26, %s1949_s30 }
 0x131   :  { %499 = vrot.lane.b32.xlu1 %v2053_v31, %s1950_s9 }
 0x16b   :  { %v96_v37 = vpop.xlane.xlu1 %95 }
 0x16c   :  { %v107_v38 = vmul.f32 %v2075_v36, %v96_v37 }
 0x16e   :  { %v109_v40 = vadd.f32 1e-05, %v107_v38 }
 0x170   :  { %1842 = vrsqrt.f32 %v109_v40  ;;  %vm117_vm6 = vweird.f32 %v109_v40 }
 0x173   :  { %v99_v42 = vpop.xlane.xlu1 %98 }
 0x174   :  { %v108_v43 = vmul.f32 %v2075_v36, %v99_v42 }
 0x176   :  { %v1843_v44 = vpop.eup %1842  ;;  %v110_v45 = vadd.f32 1e-05, %v108_v43 }
 0x177   :  { %v112_v46 = vmul.f32 %v1843_v44, %v109_v40  ;;  %vm118_vm5 = vweird.f32 %v1843_v44 }
 0x178   :  { %1844 = vrsqrt.f32 %v110_v45  ;;  %vm119_vm7 = vmor %vm117_vm6, %vm118_vm5  ;;  %vm127_vm9 = vweird.f32 %v110_v45 }
 0x179   :  { %v113_v47 = vmul.f32 %v1843_v44, %v112_v46 }
 0x17b   :  { %v114_v48 = vmul.f32 0.5, %v113_v47 }
 0x17d   :  { %v115_v49 = vsub.f32 1.5, %v114_v48 }
 0x17e   :  { %v1845_v50 = vpop.eup %1844 }
 0x17f   :  { %v122_v51 = vmul.f32 %v1845_v50, %v110_v45  ;;  %v116_v52 = vmul.f32 %v1843_v44, %v115_v49  ;;  %vm128_vm8 = vweird.f32 %v1845_v50 }
 0x180   :  { %vm129_vm10 = vmor %vm127_vm9, %vm128_vm8 }
 0x181   :  { %v123_v53 = vmul.f32 %v1845_v50, %v122_v51  ;;  %v120_v54 = vsel %vm119_vm7, %v1843_v44, %v116_v52 }
 0x182   :  { %v131_v55 = vmul.f32 %v120_v54, %v2021_v18 }
 0x183   :  { %v124_v56 = vmul.f32 0.5, %v123_v53 }
 0x184   :  { %1675 = vmatmul.msk.f32.vlgmr.msra.gmra.mxu1 %vm93_vm3, %v131_v55 }
 0x185   :  { %v125_v57 = vsub.f32 1.5, %v124_v56 }
 0x187   :  { %v126_v58 = vmul.f32 %v1845_v50, %v125_v57 }
 0x189   :  { %v130_v59 = vsel %vm129_vm10, %v1845_v50, %v126_v58 }
 0x18a   :  { %v132_v60 = vmul.f32 %v130_v59, %v2026_v21 }
 0x18b   :  { %v2153_v9 = vpop.permute.xlu1 %195 }
 0x18c   :  { %1676 = vmatmul.msk.f32.vlgmr.msra.gmra.mxu3 %vm93_vm3, %v132_v60 }
 0x193   :  { %v2173_v23 = vpop.permute.xlu1 %346 }
 0x19b   :  { %v2217_v50 = vpop.permute.xlu1 %280 }
 0x201   :  { %v2127_v1 = vpop.f32.mrf.mxu1 }
 0x202   :  { %215 = vrot.lane.b32.xlu2 %v2127_v1, %s1947_s18  ;;  %1677 = vmatmul.msk.f32.vlgmr.msra.gmra.mxu2 %vm93_vm3, %v2127_v1  ;;  %v162_v38 = vmul.f32 %v2127_v1, %v2034_v26 }
 0x20f   :  { %v2133_v2 = vpop.f32.mrf.mxu3 }
 0x210   :  { %217 = vrot.lane.b32.xlu2 %v2133_v2, %s1947_s18  ;;  %1678 = vmatmul.msk.f32.gmra.mxu2 %vm93_vm3, %v2133_v2 }
 0x218   :  { %209 = vrot.lane.b32.xlu2 %v2081_v39, %s1951_s2 }
 0x220   :  { %348 = vrot.lane.b32.xlu2 %v2081_v39, %s1948_s25 }
 0x228   :  { %207 = vrot.lane.b32.xlu2 %v2034_v26, %s1951_s2 }
 0x230   :  { %344 = vrot.lane.b32.xlu2 %v2034_v26, %s1948_s25 }
 0x25c   :  { %v216_v3 = vpop.permute.xlu2 %215 }
 0x25d   :  { %1679 = vmatmul.msk.f32.vlgmr.msrb.gmra.mxu3 %vm93_vm3, %v216_v3 }
 0x26a   :  { %v218_v4 = vpop.permute.xlu2 %217 }
 0x26b   :  { %1680 = vmatmul.msk.f32.gmra.mxu3 %vm93_vm3, %v218_v4 }
 0x272   :  { %v2157_v11 = vpop.permute.xlu2 %209 }
 0x273   :  { %v214_v15 = vmul.f32 %v2157_v11, %v2133_v2 }
 0x27a   :  { %v349_v12 = vpop.permute.xlu2 %348 }
 0x27b   :  { %v2168_v19 = vsel %vm352_vm11, %v349_v12, %v2159_v13 }
 0x282   :  { %v2161_v14 = vpop.permute.xlu2 %207 }
 0x283   :  { %v213_v24 = vmul.f32 %v2161_v14, %v2127_v1 }
 0x285   :  { %v187_v35 = vpop.f32.mrf.mxu2 }
 0x286   :  { %v201_v37 = vmul.f32 %v2153_v9, %v187_v35 }
 0x288   :  { %v203_v42 = vadd.f32 %v201_v37, %v162_v38 }
 0x28a   :  { %v345_v22 = vpop.permute.xlu2 %344  ;;  %v2202_v45 = vmul.f32 0.35355338, %v203_v42 }
 0x28b   :  { %v2178_v27 = vsel %vm352_vm11, %v345_v22, %v2173_v23  ;;  %v2252_v22 = vpop.permute.xlu1 %499 }
 0x293   :  { %v190_v43 = vpop.f32.mrf.mxu2 }
 0x2e0   :  { %v240_v5 = vpop.f32.mrf.mxu3 }
 0x2e1   :  { %v246_v10 = vmul.f32 %v240_v5, %v2153_v9 }
 0x2ee   :  { %v243_v7 = vpop.f32.mrf.mxu3 }
 0x2ef   :  { %v247_v8 = vmul.f32 %v243_v7, %v2149_v6 }
 0x2f1   :  { %252 = vrot.lane.b32.xlu0 %v247_v8, %s1951_s2 }
 0x2f9   :  { %250 = vrot.lane.b32.xlu0 %v246_v10, %s1951_s2 }
 0x363   :  { %v253_v16 = vpop.permute.xlu0 %252 }
 0x364   :  { %v2165_v17 = vadd.f32 %v253_v16, %v214_v15 }
 0x366   :  { %v358_v20 = vmul.f32 %v2168_v19, %v2165_v17 }
 0x368   :  { %374 = vrot.lane.b32.xlu0 %v358_v20, %s1947_s18 }
 0x36b   :  { %v251_v25 = vpop.permute.xlu0 %250 }
 0x36c   :  { %v2180_v29 = vadd.f32 %v251_v25, %v213_v24 }
 0x36e   :  { %v357_v33 = vmul.f32 %v2178_v27, %v2180_v29  ;;  %v505_v24 = vmul.f32 %v2252_v22, %v2180_v29 }
 0x370   :  { %282 = vrot.lane.b32.xlu0 %v2081_v39, %s1949_s30  ;;  %372 = vrot.lane.b32.xlu2 %v357_v33, %s1947_s18 }
 0x378   :  { %260 = vrot.lane.b32.xlu0 %v2081_v39, %s1952_s20  ;;  %607 = vrot.lane.b32.xlu2 %v2090_v41, %s1953_s21 }
 0x380   :  { %258 = vrot.lane.b32.xlu0 %v2034_v26, %s1952_s20 }
 0x388   :  { %361 = vrot.lane.b32.xlu0 %v2090_v41, %s1952_s20 }
 0x390   :  { %359 = vrot.lane.b32.xlu0 %v2053_v31, %s1952_s20 }
 0x398   :  { %501 = vrot.lane.b32.xlu0 %v2090_v41, %s1950_s9  ;;  %v202_v41 = vmul.f32 %v2149_v6, %v190_v43 }
 0x3a0   :  { %605 = vrot.lane.b32.xlu0 %v2053_v31, %s1953_s21  ;;  %v163_v31 = vmul.f32 %v2133_v2, %v2081_v39 }
 0x3a2   :  { %v204_v46 = vadd.f32 %v202_v41, %v163_v31 }
 0x3a4   :  { %v2209_v47 = vmul.f32 0.35355338, %v204_v46 }
 0x3ca   :  { %v373_v44 = vpop.permute.xlu2 %372 }
 0x3d2   :  { %v2247_v16 = vpop.permute.xlu2 %607 }
 0x3d3   :  { %v612_v20 = vmul.f32 %v2247_v16, %v2165_v17 }
 0x3da   :  { %v375_v40 = vpop.permute.xlu0 %374 }
 0x3db   :  { %1685 = vmatpush.xpose.msk.msrb.mxu2 %vm93_vm3, %v375_v40 }
 0x3df   :  { %1686 = vmatpush.xpose.msk.msrb.mxu2 %vm93_vm3, %v373_v44 }
 0x3e2   :  { %1687 = vmatmul.msk.f32.vlgmr.msrb.gmra.mxu2 %vm93_vm3, %v2202_v45  ;;  %v2213_v48 = vpop.permute.xlu0 %282 }
 0x3ea   :  { %1688 = vmatmul.msk.f32.gmra.mxu2 %vm93_vm3, %v2209_v47  ;;  %v2215_v49 = vpop.permute.xlu0 %260 }
 0x3eb   :  { %v265_v60 = vmul.f32 %v2215_v49, %v2165_v17 }
 0x3f2   :  { %v2221_v54 = vpop.permute.xlu0 %258 }
 0x3f3   :  { %v264_v10 = vmul.f32 %v2221_v54, %v2180_v29 }
 0x3fa   :  { %v362_v58 = vpop.permute.xlu0 %361 }
 0x3fb   :  { %v2232_v4 = vsel %vm363_vm13, %v2215_v49, %v362_v58 }
 0x3fc   :  { %v369_v7 = vmul.f32 %v2232_v4, %v2133_v2 }
 0x402   :  { %v360_v59 = vpop.permute.xlu0 %359 }
 0x403   :  { %v2228_v3 = vsel %vm363_vm13, %v2221_v54, %v360_v59 }
 0x404   :  { %v368_v5 = vmul.f32 %v2228_v3, %v2127_v1 }
 0x406   :  { %v1780_v8 = vpack.i.bf16 %v368_v5, %v369_v7 }
 0x40a   :  { %v2242_v12 = vpop.permute.xlu0 %501 }
 0x40b   :  { %v506_v15 = vmul.f32 %v2242_v12, %v2165_v17 }
 0x465   :  { %v397_v51 = vpop.f32.mrf.mxu2 }
 0x466   :  { %v398_v52 = vadd.f32 %v397_v51, %v2217_v50 }
 0x468   :  { %v403_v53 = vsel %vm319_vm12, %v398_v52, -inf }
 0x469   :  { %404 = vmax.xlane.f32.xlu2 %v403_v53  ;;  %v2260_v53 = vpop.permute.xlu0 %605 }
 0x46d   :  { %v400_v55 = vpop.f32.mrf.mxu2 }
 0x46e   :  { %v401_v56 = vadd.f32 %v400_v55, %v2213_v48  ;;  %v611_v55 = vmul.f32 %v2260_v53, %v2180_v29 }
 0x470   :  { %v406_v57 = vsel %vm319_vm12, %v401_v56, -inf }
 0x471   :  { %407 = vmax.xlane.f32.xlu1 %v406_v57 }
 0x481   :  { %278 = vrot.lane.b32.xlu2 %v265_v60, %s1947_s18 }
 0x489   :  { %1781 = vrot.lane.b32.xlu2 %v1780_v8, %s1949_s30 }
 0x48a   :  { %276 = vrot.lane.b32.xlu1 %v264_v10, %s1947_s18 }
 0x491   :  { %515 = vrot.lane.b32.xlu2 %v506_v15, %s1947_s18 }
 0x499   :  { %619 = vrot.lane.b32.xlu2 %v612_v20, %s1947_s18 }
 0x4a1   :  { %513 = vrot.lane.b32.xlu2 %v505_v24, %s1947_s18 }
 0x4dc   :  { %v405_v25 = vpop.xlane.xlu2 %404 }
 0x4dd   :  { %v409_v33 = vsub.f32 %v398_v52, %v405_v25 }
 0x4df   :  { %v411_v35 = vmul.f32 1.442695, %v409_v33 }
 0x4e1   :  { %1846 = vpow2.f32 %v411_v35 }
 0x4e4   :  { %v408_v37 = vpop.xlane.xlu1 %407  ;;  %v279_v38 = vpop.permute.xlu2 %278 }
 0x4e5   :  { %v410_v40 = vsub.f32 %v401_v56, %v408_v37  ;;  %1681 = vmatpush.xpose.msk.msrb.mxu1 %vm93_vm3, %v279_v38 }
 0x4e7   :  { %v1847_v42 = vpop.eup %1846  ;;  %v413_v17 = vmul.f32 1.442695, %v410_v40 }
 0x4e8   :  { %v415_v43 = vsel %vm319_vm12, %v1847_v42, 0.0 }
 0x4e9   :  { %1848 = vpow2.f32 %v413_v17  ;;  %416 = vadd.xlane.f32.xlu0 %v415_v43 }
 0x4ec   :  { %v1782_v44 = vpop.permute.xlu2 %1781 }
 0x4ed   :  { %v1783_v41 = vunpack.i.l.bf16 %v1782_v44  ;;  %v1784_v46 = vunpack.i.h.bf16 %v1782_v44 }
 0x4ef   :  { %v1849_v31 = vpop.eup %1848  ;;  %453 = vmatpush.msra.mxu3 %v1783_v41 }
 0x4f0   :  { %v418_v51 = vsel %vm319_vm12, %v1849_v31, 0.0 }
 0x4f1   :  { %419 = vadd.xlane.f32.xlu1 %v418_v51  ;;  %454 = vmatpush.msra.mxu3 %v1784_v46 }
 0x4f4   :  { %v516_v52 = vpop.permute.xlu2 %515 }
 0x4fc   :  { %v277_v56 = vpop.permute.xlu1 %276  ;;  %v620_v57 = vpop.permute.xlu2 %619 }
 0x4fd   :  { %1682 = vmatpush.xpose.msk.msrb.mxu1 %vm93_vm3, %v277_v56  ;;  %1699 = vmatpush.xpose.msk.msrb.mxu3 %vm93_vm3, %v620_v57 }
 0x4fe   :  { %617 = vrot.lane.b32.xlu0 %v611_v55, %s1947_s18 }
 0x500   :  { %1683 = vmatmul.msk.f32.vlgmr.msrb.gmra.mxu1 %vm93_vm3, %v2202_v45 }
 0x501   :  { %1693 = vmatpush.xpose.msk.msra.mxu1 %vm93_vm3, %v516_v52 }
 0x504   :  { %v514_v58 = vpop.permute.xlu2 %513 }
 0x505   :  { %1694 = vmatpush.xpose.msk.msra.mxu1 %vm93_vm3, %v514_v58 }
 0x508   :  { %1684 = vmatmul.msk.f32.gmra.mxu1 %vm93_vm3, %v2209_v47 }
 0x510   :  { %1695 = vmatmul.msk.f32.vlgmr.msra.gmra.mxu1 %vm93_vm3, %v2202_v45 }
 0x518   :  { %1696 = vmatmul.msk.f32.gmra.mxu1 %vm93_vm3, %v2209_v47 }
 0x55c   :  { %v417_v29 = vpop.xlane.xlu0 %416 }
 0x55d   :  { %1850 = vrcp.f32 %v417_v29 }
 0x563   :  { %v1851_v59 = vpop.eup %1850 }
 0x564   :  { %v423_v60 = vmul.f32 %v1851_v59, %v1847_v42  ;;  %v420_v5 = vpop.xlane.xlu1 %419 }
 0x565   :  { %1852 = vrcp.f32 %v420_v5 }
 0x566   :  { %1689 = vmatmul.msk.f32.vlgmr.msra.gmra.mxu3 %vm319_vm12, %v423_v60 }
 0x56b   :  { %v1853_v7 = vpop.eup %1852 }
 0x56c   :  { %v424_v8 = vmul.f32 %v1853_v7, %v1849_v31 }
 0x56e   :  { %1690 = vmatmul.msk.f32.gmra.mxu3 %vm319_vm12, %v424_v8 }
 0x570   :  { %v618_v10 = vpop.permute.xlu0 %617 }
 0x571   :  { %1700 = vmatpush.xpose.msk.msrb.mxu3 %vm93_vm3, %v618_v10 }
 0x576   :  { %1701 = vmatmul.msk.f32.vlgmr.msrb.gmra.mxu3 %vm93_vm3, %v2202_v45 }
 0x57d   :  { %v313_v15 = vpop.f32.mrf.mxu1 }
 0x57e   :  { %v314_v20 = vadd.f32 %v313_v15, %v2217_v50  ;;  %1702 = vmatmul.msk.f32.gmra.mxu3 %vm93_vm3, %v2209_v47 }
 0x580   :  { %v320_v24 = vsel %vm319_vm12, %v314_v20, -inf }
 0x581   :  { %321 = vmax.xlane.f32.xlu2 %v320_v24 }
 0x585   :  { %v316_v25 = vpop.f32.mrf.mxu1 }
 0x586   :  { %v317_v33 = vadd.f32 %v316_v25, %v2213_v48 }
 0x588   :  { %v323_v35 = vsel %vm319_vm12, %v317_v33, -inf }
 0x589   :  { %324 = vmax.xlane.f32.xlu0 %v323_v35  ;;  %v510_v35 = vmul.f32 %v2159_v13, %v2133_v2 }
 0x58d   :  { %v538_v37 = vpop.f32.mrf.mxu1 }
 0x58e   :  { %v2289_v38 = vadd.f32 %v538_v37, %v2217_v50 }
 0x590   :  { %v544_v45 = vsel %vm319_vm12, %v2289_v38, -inf }
 0x591   :  { %545 = vmax.xlane.f32.xlu1 %v544_v45 }
 0x595   :  { %v541_v40 = vpop.f32.mrf.mxu1 }
 0x596   :  { %v542_v47 = vadd.f32 %v541_v40, %v2213_v48 }
 0x598   :  { %v547_v42 = vsel %vm319_vm12, %v542_v47, -inf }
 0x599   :  { %548 = vmax.xlane.f32.xlu1 %v547_v42  ;;  %266 = vrot.lane.b32.xlu2 %v2034_v26, %s1953_s21 }
 0x5e9   :  { %v2297_v17 = vpop.f32.mrf.mxu3 }
 0x5f1   :  { %v2299_v43 = vpop.f32.mrf.mxu3 }
 0x5f4   :  { %v322_v10 = vpop.xlane.xlu2 %321 }
 0x5f5   :  { %v326_v15 = vsub.f32 %v314_v20, %v322_v10 }
 0x5f7   :  { %v328_v24 = vmul.f32 1.442695, %v326_v15 }
 0x5f9   :  { %v642_v44 = vpop.f32.mrf.mxu3 }
 0x5fa   :  { %v643_v41 = vadd.f32 %v642_v44, %v2217_v50 }
 0x5fc   :  { %v325_v31 = vpop.xlane.xlu0 %324  ;;  %v648_v46 = vsel %vm319_vm12, %v643_v41, -inf  ;;  %v2322_v44 = vpop.permute.xlu2 %266 }
 0x5fd   :  { %v327_v51 = vsub.f32 %v317_v33, %v325_v31  ;;  %649 = vmax.xlane.f32.xlu1 %v648_v46  ;;  %v272_v46 = vmul.f32 %v2322_v44, %v2127_v1 }
 0x5ff   :  { %v330_v52 = vmul.f32 1.442695, %v327_v51 }
 0x601   :  { %1854 = vpow2.f32 %v330_v52  ;;  %v645_v55 = vpop.f32.mrf.mxu3 }
 0x602   :  { %v646_v56 = vadd.f32 %v645_v55, %v2213_v48  ;;  %v613_v55 = vmul.f32 %v2252_v22, %v2127_v1 }
 0x604   :  { %v546_v57 = vpop.xlane.xlu1 %545  ;;  %v651_v26 = vsel %vm319_vm12, %v646_v56, -inf }
 0x605   :  { %652 = vmax.xlane.f32.xlu0 %v651_v26 }
 0x607   :  { %v2305_v58 = vpop.eup %1854 }
 0x608   :  { %v335_v29 = vsel %vm319_vm12, %v2305_v58, 0.0 }
 0x609   :  { %336 = vadd.xlane.f32.xlu2 %v335_v29  ;;  %v550_v29 = vsub.f32 %v2289_v38, %v546_v57 }
 0x60c   :  { %v549_v59 = vpop.xlane.xlu1 %548 }
 0x60d   :  { %v551_v60 = vsub.f32 %v542_v47, %v549_v59  ;;  %v552_v59 = vmul.f32 1.442695, %v550_v29 }
 0x60f   :  { %v554_v5 = vmul.f32 1.442695, %v551_v60 }
 0x611   :  { %1856 = vpow2.f32 %v554_v5 }
 0x612   :  { %1858 = vpow2.f32 %v328_v24 }
 0x616   :  { %268 = vrot.lane.b32.xlu1 %v2081_v39, %s1953_s21  ;;  %v509_v39 = vmul.f32 %v2173_v23, %v2127_v1 }
 0x617   :  { %v2311_v7 = vpop.eup %1856 }
 0x618   :  { %v559_v8 = vsel %vm319_vm12, %v2311_v7, 0.0  ;;  %v1859_v25 = vpop.eup %1858  ;;  %v1790_v37 = vpack.i.bf16 %v509_v39, %v510_v35 }
 0x619   :  { %560 = vadd.xlane.f32.xlu2 %v559_v8  ;;  %v332_v33 = vsel %vm319_vm12, %v1859_v25, 0.0 }
 0x640   :  { %333 = vadd.xlane.f32.xlu1 %v332_v33 }
 0x659   :  { %1791 = vrot.lane.b32.xlu1 %v1790_v37, %s1949_s30 }
 0x670   :  { %v650_v45 = vpop.xlane.xlu1 %649 }
 0x671   :  { %v654_v40 = vsub.f32 %v643_v41, %v650_v45  ;;  %v614_v41 = vmul.f32 %v2242_v12, %v2133_v2 }
 0x673   :  { %v656_v47 = vmul.f32 1.442695, %v654_v40  ;;  %v1795_v26 = vpack.i.bf16 %v613_v55, %v614_v41 }
 0x675   :  { %1860 = vpow2.f32 %v656_v47 }
 0x676   :  { %1862 = vpow2.f32 %v552_v59  ;;  %v1805_v59 = vpack.i.bf16 %v2068_v34, %v2061_v32 }
 0x678   :  { %v653_v60 = vpop.xlane.xlu0 %652 }
 0x679   :  { %v655_v5 = vsub.f32 %v646_v56, %v653_v60 }
 0x67b   :  { %v1861_v20 = vpop.eup %1860  ;;  %v658_v8 = vmul.f32 1.442695, %v655_v5 }
 0x67c   :  { %v660_v42 = vsel %vm319_vm12, %v1861_v20, 0.0  ;;  %v1863_v10 = vpop.eup %1862  ;;  %v337_v38 = vpop.xlane.xlu2 %336 }
 0x67d   :  { %661 = vadd.xlane.f32.xlu2 %v660_v42  ;;  %1864 = vpow2.f32 %v658_v8  ;;  %v556_v15 = vsel %vm319_vm12, %v1863_v10, 0.0 }
 0x683   :  { %v1865_v24 = vpop.eup %1864 }
 0x688   :  { %v2324_v31 = vpop.permute.xlu1 %268 }
 0x689   :  { %v273_v51 = vmul.f32 %v2324_v31, %v2133_v2  ;;  %v663_v2 = vsel %vm319_vm12, %v1865_v24, 0.0 }
 0x68b   :  { %v1785_v52 = vpack.i.bf16 %v272_v46, %v273_v51 }
 0x68c   :  { %v561_v57 = vpop.xlane.xlu2 %560 }
 0x68d   :  { %1786 = vrot.lane.b32.xlu0 %v1785_v52, %s1949_s30 }
 0x695   :  { %1796 = vrot.lane.b32.xlu2 %v1795_v26, %s1949_s30 }
 0x6b3   :  { %v334_v1 = vpop.xlane.xlu1 %333 }
 0x6b4   :  { %1866 = vrcp.f32 %v334_v1 }
 0x6b5   :  { %1868 = vrcp.f32 %v337_v38 }
 0x6b7   :  { %557 = vadd.xlane.f32.xlu0 %v556_v15 }
 0x6ba   :  { %v1867_v45 = vpop.eup %1866 }
 0x6bb   :  { %v340_v46 = vmul.f32 %v1867_v45, %v1859_v25  ;;  %v1869_v41 = vpop.eup %1868  ;;  %v1800_v25 = vpack.i.bf16 %v2048_v30, %v2041_v28 }
 0x6bc   :  { %v341_v55 = vmul.f32 %v1869_v41, %v2305_v58 }
 0x6bd   :  { %1801 = vrot.lane.b32.xlu1 %v1800_v25, %s1951_s2  ;;  %v84_v25 = vld [vmem:[%s2710_s4 + $0x8] sm:$0xff] }
 0x6bf   :  { %664 = vadd.xlane.f32.xlu0 %v663_v2 }
 0x6cb   :  { %v1792_v33 = vpop.permute.xlu1 %1791 }
 0x6cc   :  { %v1793_v35 = vunpack.i.l.bf16 %v1792_v33  ;;  %v1794_v39 = vunpack.i.h.bf16 %v1792_v33 }
 0x6ce   :  { %594 = vmatpush.msra.mxu2 %v1793_v35 }
 0x6d0   :  { %595 = vmatpush.msra.mxu2 %v1794_v39 }
 0x6d3   :  { %1806 = vrot.lane.b32.xlu0 %v1805_v59, %s1951_s2 }
 0x6f0   :  { %v662_v37 = vpop.xlane.xlu2 %661 }
 0x6f1   :  { %1870 = vrcp.f32 %v662_v37 }
 0x6f7   :  { %v1871_v26 = vpop.eup %1870 }
 0x6f8   :  { %v1797_v47 = vpop.permute.xlu2 %1796  ;;  %v668_v29 = vmul.f32 %v1871_v26, %v1861_v20 }
 0x6f9   :  { %v1798_v51 = vunpack.i.l.bf16 %v1797_v47  ;;  %v1799_v52 = vunpack.i.h.bf16 %v1797_v47 }
 0x6ff   :  { %v1787_v56 = vpop.permute.xlu0 %1786 }
 0x700   :  { %v1788_v40 = vunpack.i.l.bf16 %v1787_v56  ;;  %v1789_v42 = vunpack.i.h.bf16 %v1787_v56 }
 0x702   :  { %490 = vmatpush.msrb.mxu0 %v1788_v40 }
 0x704   :  { %491 = vmatpush.msrb.mxu0 %v1789_v42 }
 0x705   :  { %1691 = vmatmul.msk.f32.vlgmr.msrb.gmra.mxu0 %vm319_vm12, %v340_v46 }
 0x706   :  { %698 = vmatpush.msra.mxu0 %v1798_v51 }
 0x708   :  { %699 = vmatpush.msra.mxu0 %v1799_v52 }
 0x70d   :  { %1692 = vmatmul.msk.f32.gmra.mxu0 %vm319_vm12, %v341_v55 }
 0x715   :  { %1703 = vmatmul.msk.f32.vlgmr.msra.gmra.mxu0 %vm319_vm12, %v668_v29  ;;  %v88_v29 = vld [vmem:[%s2710_s4 + $0x28] sm:$0xff] }
 0x72a   :  { %v558_v60 = vpop.xlane.xlu0 %557 }
 0x72b   :  { %1872 = vrcp.f32 %v558_v60 }
 0x72c   :  { %1874 = vrcp.f32 %v561_v57 }
 0x72f   :  { %v1802_v32 = vpop.permute.xlu1 %1801 }
 0x730   :  { %v1804_v2 = vunpack.i.h.bf16 %v1802_v32  ;;  %v1803_v1 = vunpack.i.l.bf16 %v1802_v32 }
 0x731   :  { %v1873_v5 = vpop.eup %1872 }
 0x732   :  { %v564_v58 = vmul.f32 %v1873_v5, %v1863_v10  ;;  %v665_v8 = vpop.xlane.xlu0 %664  ;;  %v1875_v20 = vpop.eup %1874  ;;  %743 = vmatpush.msrb.mxu1 %v1803_v1 }
 0x733   :  { %1876 = vrcp.f32 %v665_v8  ;;  %v565_v28 = vmul.f32 %v1875_v20, %v2311_v7 }
 0x734   :  { %1697 = vmatmul.msk.f32.vlgmr.msra.gmra.mxu2 %vm319_vm12, %v564_v58  ;;  %744 = vmatpush.msrb.mxu1 %v1804_v2 }
 0x739   :  { %v1877_v15 = vpop.eup %1876 }
 0x73a   :  { %v669_v30 = vmul.f32 %v1877_v15, %v1865_v24 }
 0x73c   :  { %1698 = vmatmul.msk.f32.gmra.mxu2 %vm319_vm12, %v565_v28  ;;  %1704 = vmatmul.msk.f32.gmra.mxu0 %vm319_vm12, %v669_v30 }
 0x745   :  { %v1807_v34 = vpop.permute.xlu0 %1806 }
 0x746   :  { %v1808_v33 = vunpack.i.l.bf16 %v1807_v34  ;;  %v1809_v10 = vunpack.i.h.bf16 %v1807_v34 }
 0x748   :  { %745 = vmatpush.msrb.mxu1 %v1808_v33 }
 0x74a   :  { %746 = vmatpush.msrb.mxu1 %v1809_v10 }
 0x74c   :  { %972 = vmatpush.msra.mxu1 %v2102_v61 }
 0x74e   :  { %973 = vmatpush.msra.mxu1 %v2107_v62 }
 0x750   :  { %974 = vmatpush.msra.mxu1 %v2114_v63 }
 0x752   :  { %975 = vmatpush.msra.mxu1 %v2123_v0 }
 0x782   :  { %v493_v7 = vpop.f32.mrf.mxu0 }
 0x783   :  { %v494_v35 = vadd.f32 %v493_v7, %v2297_v17 }
 0x78a   :  { %v496_v24 = vpop.f32.mrf.mxu0 }
 0x78b   :  { %v497_v56 = vadd.f32 %v496_v24, %v2299_v43 }
 0x792   :  { %v701_v57 = vpop.f32.mrf.mxu0 }
 0x7b7   :  { %v597_v39 = vpop.f32.mrf.mxu2 }
 0x7b8   :  { %v603_v38 = vadd.f32 %v597_v39, %v494_v35  ;;  %v848_v39 = vld [vmem:[%s2711_s5 + $0x38] sm:$0xff] }
 0x7b9   :  { %v704_v47 = vpop.f32.mrf.mxu0  ;;  %863 = vmatpush.msra.mxu3 %v848_v39 }
 0x7ba   :  { %v707_v37 = vadd.f32 %v701_v57, %v603_v38  ;;  %v847_v38 = vld [vmem:[%s2711_s5 + $0x30] sm:$0xff]  ;;  %v846_v57 = vld [vmem:[%s2711_s5 + $0x28] sm:$0xff] }
 0x7bb   :  { %864 = vmatpush.msra.mxu3 %v847_v38 }
 0x7bc   :  { %1705 = vmatmul.msk.f32.vlgmr.msrb.gmra.mxu1 %vm93_vm3, %v707_v37  ;;  %v845_v37 = vld [vmem:[%s2711_s5 + $0x20] sm:$0xff] }
 0x7bd   :  { %865 = vmatpush.msra.mxu3 %v846_v57 }
 0x7bf   :  { %v600_v45 = vpop.f32.mrf.mxu2  ;;  %866 = vmatpush.msra.mxu3 %v845_v37 }
 0x7c0   :  { %v604_v40 = vadd.f32 %v600_v45, %v497_v56  ;;  %v844_v56 = vld [vmem:[%s2711_s5 + $0x18] sm:$0xff]  ;;  %v843_v45 = vld [vmem:[%s2711_s5 + $0x10] sm:$0xff] }
 0x7c1   :  { %867 = vmatpush.msra.mxu3 %v844_v56 }
 0x7c2   :  { %v708_v42 = vadd.f32 %v704_v47, %v604_v40  ;;  %v842_v47 = vld [vmem:[%s2711_s5 + $0x8] sm:$0xff] }
 0x7c3   :  { %868 = vmatpush.msra.mxu3 %v843_v45 }
 0x7c4   :  { %1706 = vmatmul.msk.f32.gmra.mxu1 %vm93_vm3, %v708_v42 }
 0x7c5   :  { %869 = vmatpush.msra.mxu3 %v842_v47 }
 0x839   :  { %v748_v46 = vpop.f32.mrf.mxu1 }
 0x83a   :  { %v2362_v51 = vadd.f32 %v748_v46, %v2021_v18  ;;  %v90_v18 = vld [vmem:[%s2710_s4 + $0x38] sm:$0xff] }
 0x83b   :  { %808 = vmatpush.msrb.mxu2 %v90_v18 }
 0x83c   :  { %v756_v17 = vmul.f32 %v2362_v51, %v2362_v51 }
 0x83d   :  { %809 = vmatpush.msrb.mxu2 %v88_v29 }
 0x83e   :  { %v758_v52 = vsel %vm93_vm3, %v756_v17, 0.0  ;;  %v841_v17 = vld [vmem:[%s2711_s5] sm:$0xff] }
 0x83f   :  { %759 = vadd.xlane.f32.xlu1 %v758_v52  ;;  %870 = vmatpush.msra.mxu3 %v841_v17 }
 0x841   :  { %v751_v41 = vpop.f32.mrf.mxu1 }
 0x842   :  { %v2368_v55 = vadd.f32 %v751_v41, %v2026_v21  ;;  %v86_v21 = vld [vmem:[%s2710_s4 + $0x18] sm:$0xff] }
 0x843   :  { %810 = vmatpush.msrb.mxu2 %v86_v21 }
 0x844   :  { %v757_v43 = vmul.f32 %v2368_v55, %v2368_v55 }
 0x845   :  { %811 = vmatpush.msrb.mxu2 %v84_v25 }
 0x846   :  { %v761_v26 = vsel %vm93_vm3, %v757_v43, 0.0 }
 0x847   :  { %762 = vadd.xlane.f32.xlu2 %v761_v26  ;;  %1011 = vmatpush.msra.mxu2 %v2102_v61 }
 0x849   :  { %1012 = vmatpush.msra.mxu2 %v2107_v62 }
 0x84b   :  { %1013 = vmatpush.msra.mxu2 %v2114_v63 }
 0x84d   :  { %1014 = vmatpush.msra.mxu2 %v2123_v0 }
 0x8b2   :  { %v760_v59 = vpop.xlane.xlu1 %759 }
 0x8b3   :  { %v764_v60 = vmul.f32 %v760_v59, %v2075_v36 }
 0x8b5   :  { %v766_v5 = vadd.f32 1e-05, %v764_v60 }
 0x8b7   :  { %1878 = vrsqrt.f32 %v766_v5  ;;  %vm774_vm15 = vweird.f32 %v766_v5 }
 0x8ba   :  { %v763_v58 = vpop.xlane.xlu2 %762 }
 0x8bb   :  { %v765_v8 = vmul.f32 %v763_v58, %v2075_v36 }
 0x8bd   :  { %v1879_v20 = vpop.eup %1878  ;;  %v767_v15 = vadd.f32 1e-05, %v765_v8 }
 0x8be   :  { %v769_v28 = vmul.f32 %v1879_v20, %v766_v5  ;;  %vm775_vm14 = vweird.f32 %v1879_v20 }
 0x8bf   :  { %1880 = vrsqrt.f32 %v767_v15  ;;  %vm776_vm1 = vmor %vm774_vm15, %vm775_vm14  ;;  %vm784_vm4 = vweird.f32 %v767_v15 }
 0x8c0   :  { %v770_v30 = vmul.f32 %v1879_v20, %v769_v28 }
 0x8c2   :  { %v771_v61 = vmul.f32 0.5, %v770_v30 }
 0x8c4   :  { %v772_v32 = vsub.f32 1.5, %v771_v61 }
 0x8c5   :  { %v1881_v62 = vpop.eup %1880 }
 0x8c6   :  { %v773_v63 = vmul.f32 %v1879_v20, %v772_v32  ;;  %v779_v34 = vmul.f32 %v1881_v62, %v767_v15  ;;  %vm785_vm2 = vweird.f32 %v1881_v62 }
 0x8c7   :  { %vm786_vm5 = vmor %vm784_vm4, %vm785_vm2 }
 0x8c8   :  { %v777_v0 = vsel %vm776_vm1, %v1879_v20, %v773_v63  ;;  %v780_v2 = vmul.f32 %v1881_v62, %v779_v34 }
 0x8c9   :  { %v788_v1 = vmul.f32 %v777_v0, %v2362_v51 }
 0x8ca   :  { %v781_v33 = vmul.f32 0.5, %v780_v2  ;;  %v2444_v2 = vld [vmem:[%s2710_s4 + $0x60] sm:$0xff] }
 0x8cb   :  { %1707 = vmatmul.msk.f32.vlgmr.msrb.gmra.mxu2 %vm93_vm3, %v788_v1  ;;  %v2456_v1 = vld [vmem:[%s2710_s4 + $0x40] sm:$0xff] }
 0x8cc   :  { %v782_v10 = vsub.f32 1.5, %v781_v33 }
 0x8ce   :  { %v783_v7 = vmul.f32 %v1881_v62, %v782_v10 }
 0x8d0   :  { %v787_v24 = vsel %vm786_vm5, %v1881_v62, %v783_v7 }
 0x8d1   :  { %v789_v35 = vmul.f32 %v787_v24, %v2368_v55 }
 0x8d3   :  { %1708 = vmatmul.msk.f32.gmra.mxu2 %vm93_vm3, %v789_v35 }
 0x94e   :  { %v813_v40 = vpop.f32.mrf.mxu2 }
 0x94f   :  { %833 = vrot.lane.b32.xlu0 %v813_v40, %s1949_s30  ;;  %v819_v46 = vsub.f32 0.0, %v813_v40 }
 0x951   :  { %v821_v52 = vmul.f32 1.442695, %v819_v46 }
 0x953   :  { %1882 = vpow2.f32 %v821_v52 }
 0x956   :  { %v816_v42 = vpop.f32.mrf.mxu2 }
 0x957   :  { %835 = vrot.lane.b32.xlu0 %v816_v42, %s1949_s30  ;;  %v820_v41 = vsub.f32 0.0, %v816_v42 }
 0x959   :  { %v823_v43 = vmul.f32 1.442695, %v820_v41  ;;  %v1883_v26 = vpop.eup %1882 }
 0x95a   :  { %v825_v18 = vadd.f32 1.0, %v1883_v26 }
 0x95b   :  { %1884 = vpow2.f32 %v823_v43 }
 0x95c   :  { %1886 = vrcp.f32 %v825_v18 }
 0x961   :  { %v1885_v29 = vpop.eup %1884 }
 0x962   :  { %v826_v21 = vadd.f32 1.0, %v1885_v29  ;;  %v1887_v25 = vpop.eup %1886 }
 0x963   :  { %v829_v59 = vmul.f32 %v1887_v25, %v813_v40 }
 0x964   :  { %1888 = vrcp.f32 %v826_v21 }
 0x96a   :  { %v1889_v58 = vpop.eup %1888 }
 0x96b   :  { %v830_v8 = vmul.f32 %v1889_v58, %v816_v42 }
 0x9c1   :  { %v834_v60 = vpop.permute.xlu0 %833 }
 0x9c2   :  { %v839_v5 = vmul.f32 %v834_v60, %v829_v59 }
 0x9c4   :  { %1709 = vmatmul.msk.f32.vlgmr.msra.gmra.mxu3 %vm53_vm0, %v839_v5 }
 0x9c9   :  { %v836_v20 = vpop.permute.xlu0 %835 }
 0x9ca   :  { %v840_v15 = vmul.f32 %v836_v20, %v830_v8 }
 0x9cc   :  { %1710 = vmatmul.msk.f32.gmra.mxu3 %vm53_vm0, %v840_v15 }
 0xa47   :  { %v872_v28 = vpop.f32.mrf.mxu3 }
 0xa48   :  { %v2424_v30 = vadd.f32 %v872_v28, %v2362_v51  ;;  %v2438_v51 = vld [vmem:[%s2710_s4 + $0x70] sm:$0xff] }
 0xa49   :  { %941 = vmatpush.msrb.mxu0 %v2438_v51  ;;  %v1830_v33 = vpack.i.bf16 %v2444_v2, %v2438_v51 }
 0xa4a   :  { %v889_v61 = vmul.f32 %v2424_v30, %v2424_v30 }
 0xa4b   :  { %942 = vmatpush.msrb.mxu0 %v2444_v2 }
 0xa4c   :  { %v891_v32 = vsel %vm93_vm3, %v889_v61, 0.0 }
 0xa4d   :  { %892 = vadd.xlane.f32.xlu0 %v891_v32 }
 0xa4f   :  { %v875_v62 = vpop.f32.mrf.mxu3 }
 0xa50   :  { %v2430_v63 = vadd.f32 %v875_v62, %v2368_v55  ;;  %v2450_v55 = vld [vmem:[%s2710_s4 + $0x50] sm:$0xff] }
 0xa51   :  { %943 = vmatpush.msrb.mxu0 %v2450_v55  ;;  %v1835_v10 = vpack.i.bf16 %v2456_v1, %v2450_v55 }
 0xa52   :  { %v890_v34 = vmul.f32 %v2430_v63, %v2430_v63 }
 0xa53   :  { %944 = vmatpush.msrb.mxu0 %v2456_v1 }
 0xa54   :  { %v894_v0 = vsel %vm93_vm3, %v890_v34, 0.0 }
 0xa55   :  { %895 = vadd.xlane.f32.xlu1 %v894_v0 }
 0xac0   :  { %v893_v7 = vpop.xlane.xlu0 %892 }
 0xac1   :  { %v897_v24 = vmul.f32 %v893_v7, %v2075_v36 }
 0xac3   :  { %v899_v35 = vadd.f32 1e-05, %v897_v24 }
 0xac5   :  { %1890 = vrsqrt.f32 %v899_v35  ;;  %vm907_vm7 = vweird.f32 %v899_v35 }
 0xac8   :  { %v896_v39 = vpop.xlane.xlu1 %895 }
 0xac9   :  { %v898_v38 = vmul.f32 %v896_v39, %v2075_v36 }
 0xacb   :  { %v1891_v57 = vpop.eup %1890  ;;  %v900_v37 = vadd.f32 1e-05, %v898_v38 }
 0xacc   :  { %v902_v56 = vmul.f32 %v1891_v57, %v899_v35  ;;  %vm908_vm6 = vweird.f32 %v1891_v57 }
 0xacd   :  { %1892 = vrsqrt.f32 %v900_v37  ;;  %vm909_vm8 = vmor %vm907_vm7, %vm908_vm6  ;;  %vm917_vm10 = vweird.f32 %v900_v37 }
 0xace   :  { %v903_v45 = vmul.f32 %v1891_v57, %v902_v56 }
 0xad0   :  { %v904_v40 = vmul.f32 0.5, %v903_v45 }
 0xad2   :  { %v905_v47 = vsub.f32 1.5, %v904_v40  ;;  %v1943_v40 = vld [vmem:[%s2709_s1 + $0x10] sm:$0xff] }
 0xad3   :  { %v1893_v42 = vpop.eup %1892 }
 0xad4   :  { %v906_v46 = vmul.f32 %v1891_v57, %v905_v47  ;;  %v912_v17 = vmul.f32 %v1893_v42, %v900_v37  ;;  %vm918_vm9 = vweird.f32 %v1893_v42 }
 0xad5   :  { %vm919_vm11 = vmor %vm917_vm10, %vm918_vm9 }
 0xad6   :  { %v910_v52 = vsel %vm909_vm8, %v1891_v57, %v906_v46  ;;  %v913_v41 = vmul.f32 %v1893_v42, %v912_v17 }
 0xad7   :  { %v921_v43 = vmul.f32 %v910_v52, %v2424_v30 }
 0xad8   :  { %v914_v26 = vmul.f32 0.5, %v913_v41 }
 0xad9   :  { %1719 = vmatmul.msk.f32.vlgmr.msrb.gmra.mxu0 %vm93_vm3, %v921_v43 }
 0xada   :  { %v915_v18 = vsub.f32 1.5, %v914_v26 }
 0xadc   :  { %v916_v29 = vmul.f32 %v1893_v42, %v915_v18 }
 0xade   :  { %v920_v21 = vsel %vm919_vm11, %v1893_v42, %v916_v29 }
 0xadf   :  { %v922_v25 = vmul.f32 %v920_v21, %v2430_v63 }
 0xae1   :  { %1720 = vmatmul.msk.f32.gmra.mxu0 %vm93_vm3, %v922_v25 }
 0xb56   :  { %v2469_v59 = vpop.f32.mrf.mxu0 }
 0xb57   :  { %1721 = vmatmul.msk.f32.vlgmr.msra.gmra.mxu1 %vm93_vm3, %v2469_v59  ;;  %991 = vrot.lane.b32.xlu1 %v2469_v59, %s1947_s18  ;;  %v989_v61 = vmul.f32 %v2469_v59, %v2161_v14  ;;  %v1101_v21 = vmul.f32 %v2469_v59, %v2228_v3 }
 0xb5e   :  { %v2475_v60 = vpop.f32.mrf.mxu0 }
 0xb5f   :  { %993 = vrot.lane.b32.xlu2 %v2475_v60, %s1947_s18  ;;  %1722 = vmatmul.msk.f32.gmra.mxu1 %vm93_vm3, %v2475_v60  ;;  %v990_v0 = vmul.f32 %v2475_v60, %v2157_v11  ;;  %v1942_v11 = vld [vmem:[%s2709_s1] sm:$0xff]  ;;  %v953_v47 = vmul.f32 %v1943_v40, %v2475_v60  ;;  %v1102_v29 = vmul.f32 %v2475_v60, %v2232_v4 }
 0xb60   :  { %v952_v38 = vmul.f32 %v1942_v11, %v2469_v59 }
 0xb61   :  { %v1810_v25 = vpack.i.bf16 %v1101_v21, %v1102_v29 }
 0xbb9   :  { %v994_v58 = vpop.permute.xlu2 %993 }
 0xbc9   :  { %v992_v5 = vpop.permute.xlu1 %991 }
 0xbca   :  { %1723 = vmatmul.msk.f32.vlgmr.msra.gmra.mxu2 %vm93_vm3, %v992_v5 }
 0xbd2   :  { %1724 = vmatmul.msk.f32.gmra.mxu2 %vm93_vm3, %v994_v58 }
 0xbd4   :  { %v977_v14 = vpop.f32.mrf.mxu1 }
 0xc4d   :  { %v1016_v8 = vpop.f32.mrf.mxu2 }
 0xc4e   :  { %v1022_v20 = vmul.f32 %v1016_v8, %v2153_v9 }
 0xc50   :  { %1026 = vrot.lane.b32.xlu2 %v1022_v20, %s1951_s2 }
 0xc55   :  { %v1019_v15 = vpop.f32.mrf.mxu2 }
 0xc56   :  { %v1023_v28 = vmul.f32 %v1019_v15, %v2149_v6 }
 0xc58   :  { %1028 = vrot.lane.b32.xlu0 %v1023_v28, %s1951_s2 }
 0xcaa   :  { %v1027_v32 = vpop.permute.xlu2 %1026 }
 0xcab   :  { %v1032_v62 = vadd.f32 %v1027_v32, %v989_v61 }
 0xcad   :  { %v1099_v34 = vmul.f32 %v1032_v62, %v2178_v27  ;;  %v983_v27 = vmul.f32 %v977_v14, %v2153_v9  ;;  %v1034_v18 = vmul.f32 %v1032_v62, %v2221_v54  ;;  %v1232_v58 = vmul.f32 %v1032_v62, %v2252_v22 }
 0xcae   :  { %v1330_v54 = vmul.f32 %v1032_v62, %v2260_v53 }
 0xcaf   :  { %1105 = vrot.lane.b32.xlu2 %v1099_v34, %s1947_s18 }
 0xcca   :  { %v1029_v7 = vpop.permute.xlu0 %1028 }
 0xccb   :  { %v2493_v24 = vadd.f32 %v1029_v7, %v990_v0 }
 0xccd   :  { %v1100_v35 = vmul.f32 %v2493_v24, %v2168_v19  ;;  %v1035_v39 = vmul.f32 %v2493_v24, %v2215_v49  ;;  %v985_v19 = vadd.f32 %v983_v27, %v952_v38  ;;  %v980_v49 = vpop.f32.mrf.mxu1  ;;  %v1233_v5 = vmul.f32 %v2493_v24, %v2242_v12 }
 0xcce   :  { %v984_v9 = vmul.f32 %v980_v49, %v2149_v6  ;;  %v1331_v27 = vmul.f32 %v2493_v24, %v2247_v16 }
 0xccf   :  { %1107 = vrot.lane.b32.xlu1 %v1100_v35, %s1947_s18  ;;  %1042 = vrot.lane.b32.xlu0 %v1035_v39, %s1947_s18  ;;  %v2509_v45 = vmul.f32 0.35355338, %v985_v19 }
 0xcd0   :  { %v986_v42 = vadd.f32 %v984_v9, %v953_v47 }
 0xcd2   :  { %v2518_v46 = vmul.f32 0.35355338, %v986_v42 }
 0xd09   :  { %v1106_v56 = vpop.permute.xlu2 %1105 }
 0xd41   :  { %v1108_v57 = vpop.permute.xlu1 %1107  ;;  %v1043_v37 = vpop.permute.xlu0 %1042 }
 0xd42   :  { %1725 = vmatpush.xpose.msk.msrb.mxu3 %vm93_vm3, %v1043_v37  ;;  %1729 = vmatpush.xpose.msk.msra.mxu0 %vm93_vm3, %v1108_v57 }
 0xd46   :  { %1730 = vmatpush.xpose.msk.msra.mxu0 %vm93_vm3, %v1106_v56 }
 0xd49   :  { %1731 = vmatmul.msk.f32.vlgmr.msra.gmra.mxu0 %vm93_vm3, %v2509_v45 }
 0xd51   :  { %1732 = vmatmul.msk.f32.gmra.mxu0 %vm93_vm3, %v2518_v46 }
 0xdc6   :  { %v1130_v17 = vpop.f32.mrf.mxu0 }
 0xdc7   :  { %v1131_v52 = vadd.f32 %v1130_v17, %v2217_v50 }
 0xdc9   :  { %v1136_v6 = vsel %vm319_vm12, %v1131_v52, -inf }
 0xdca   :  { %1137 = vmax.xlane.f32.xlu1 %v1136_v6 }
 0xdce   :  { %v1133_v41 = vpop.f32.mrf.mxu0 }
 0xdcf   :  { %v1134_v43 = vadd.f32 %v1133_v41, %v2213_v48 }
 0xdd1   :  { %v1139_v26 = vsel %vm319_vm12, %v1134_v43, -inf }
 0xdd2   :  { %1140 = vmax.xlane.f32.xlu2 %v1139_v26 }
 0xde3   :  { %1040 = vrot.lane.b32.xlu1 %v1034_v18, %s1947_s18 }
 0xdea   :  { %1811 = vrot.lane.b32.xlu2 %v1810_v25, %s1949_s30 }
 0xdeb   :  { %1240 = vrot.lane.b32.xlu1 %v1233_v5, %s1947_s18 }
 0xdf2   :  { %1238 = vrot.lane.b32.xlu2 %v1232_v58, %s1947_s18 }
 0xdf3   :  { %1336 = vrot.lane.b32.xlu1 %v1330_v54, %s1947_s18 }
 0xe3d   :  { %v1138_v4 = vpop.xlane.xlu1 %1137 }
 0xe3e   :  { %v1142_v8 = vsub.f32 %v1131_v52, %v1138_v4 }
 0xe40   :  { %v1144_v20 = vmul.f32 1.442695, %v1142_v8 }
 0xe42   :  { %1894 = vpow2.f32 %v1144_v20 }
 0xe45   :  { %v1141_v3 = vpop.xlane.xlu2 %1140 }
 0xe46   :  { %v1143_v15 = vsub.f32 %v1134_v43, %v1141_v3 }
 0xe48   :  { %v1895_v28 = vpop.eup %1894  ;;  %v1146_v61 = vmul.f32 1.442695, %v1143_v15 }
 0xe49   :  { %v1148_v32 = vsel %vm319_vm12, %v1895_v28, 0.0 }
 0xe4a   :  { %1896 = vpow2.f32 %v1146_v61  ;;  %1149 = vadd.xlane.f32.xlu0 %v1148_v32 }
 0xe4d   :  { %v1812_v34 = vpop.permute.xlu2 %1811 }
 0xe4e   :  { %v1813_v0 = vunpack.i.l.bf16 %v1812_v34  ;;  %v1814_v53 = vunpack.i.h.bf16 %v1812_v34 }
 0xe50   :  { %v1897_v7 = vpop.eup %1896  ;;  %1186 = vmatpush.msrb.mxu1 %v1813_v0 }
 0xe51   :  { %v1151_v62 = vsel %vm319_vm12, %v1897_v7, 0.0 }
 0xe52   :  { %1187 = vmatpush.msrb.mxu1 %v1814_v53  ;;  %1152 = vadd.xlane.f32.xlu0 %v1151_v62 }
 0xe55   :  { %v1041_v35 = vpop.permute.xlu1 %1040  ;;  %v1239_v14 = vpop.permute.xlu2 %1238 }
 0xe56   :  { %1726 = vmatpush.xpose.msk.msrb.mxu3 %vm93_vm3, %v1041_v35 }
 0xe59   :  { %1727 = vmatmul.msk.f32.vlgmr.msrb.gmra.mxu3 %vm93_vm3, %v2509_v45 }
 0xe5d   :  { %v1241_v39 = vpop.permute.xlu1 %1240 }
 0xe5e   :  { %1737 = vmatpush.xpose.msk.msra.mxu3 %vm93_vm3, %v1241_v39  ;;  %v1037_v39 = vmul.f32 %v2475_v60, %v2324_v31 }
 0xe61   :  { %1728 = vmatmul.msk.f32.gmra.mxu3 %vm93_vm3, %v2518_v46 }
 0xe62   :  { %1738 = vmatpush.xpose.msk.msra.mxu3 %vm93_vm3, %v1239_v14 }
 0xe65   :  { %v1337_v24 = vpop.permute.xlu1 %1336 }
 0xe66   :  { %1338 = vrot.lane.b32.xlu0 %v1331_v27, %s1947_s18  ;;  %v1235_v27 = vmul.f32 %v2475_v60, %v2159_v13 }
 0xe69   :  { %1739 = vmatmul.msk.f32.vlgmr.msra.gmra.mxu3 %vm93_vm3, %v2509_v45 }
 0xe71   :  { %1740 = vmatmul.msk.f32.gmra.mxu3 %vm93_vm3, %v2518_v46 }
 0xebd   :  { %v1150_v11 = vpop.xlane.xlu0 %1149 }
 0xebe   :  { %1898 = vrcp.f32 %v1150_v11  ;;  %v1234_v11 = vmul.f32 %v2469_v59, %v2173_v23 }
 0xec4   :  { %v1899_v38 = vpop.eup %1898 }
 0xec5   :  { %v1156_v57 = vmul.f32 %v1899_v38, %v1895_v28  ;;  %v1153_v37 = vpop.xlane.xlu0 %1152  ;;  %v1825_v38 = vpack.i.bf16 %v1234_v11, %v1235_v27 }
 0xec6   :  { %1900 = vrcp.f32 %v1153_v37 }
 0xec7   :  { %1733 = vmatmul.msk.f32.vlgmr.msrb.gmra.mxu1 %vm319_vm12, %v1156_v57 }
 0xecc   :  { %v1901_v19 = vpop.eup %1900 }
 0xecd   :  { %v1157_v49 = vmul.f32 %v1901_v19, %v1897_v7 }
 0xecf   :  { %1734 = vmatmul.msk.f32.gmra.mxu1 %vm319_vm12, %v1157_v49 }
 0xed8   :  { %v1339_v16 = vpop.permute.xlu0 %1338 }
 0xed9   :  { %1743 = vmatpush.xpose.msk.msra.mxu1 %vm93_vm3, %v1339_v16 }
 0xedc   :  { %v1071_v56 = vpop.f32.mrf.mxu3 }
 0xedd   :  { %v1072_v9 = vadd.f32 %v1071_v56, %v2217_v50  ;;  %1744 = vmatpush.xpose.msk.msra.mxu1 %vm93_vm3, %v1337_v24 }
 0xedf   :  { %v1077_v40 = vsel %vm319_vm12, %v1072_v9, -inf }
 0xee0   :  { %1078 = vmax.xlane.f32.xlu2 %v1077_v40  ;;  %1745 = vmatmul.msk.f32.vlgmr.msra.gmra.mxu1 %vm93_vm3, %v2509_v45 }
 0xee4   :  { %v1074_v47 = vpop.f32.mrf.mxu3 }
 0xee5   :  { %v1075_v42 = vadd.f32 %v1074_v47, %v2213_v48  ;;  %v1333_v47 = vmul.f32 %v2475_v60, %v2242_v12 }
 0xee7   :  { %v1080_v17 = vsel %vm319_vm12, %v1075_v42, -inf }
 0xee8   :  { %1081 = vmax.xlane.f32.xlu1 %v1080_v17  ;;  %1746 = vmatmul.msk.f32.gmra.mxu1 %vm93_vm3, %v2518_v46  ;;  %v1332_v17 = vmul.f32 %v2469_v59, %v2252_v22 }
 0xeec   :  { %v1263_v52 = vpop.f32.mrf.mxu3 }
 0xeed   :  { %v1264_v6 = vadd.f32 %v1263_v52, %v2217_v50  ;;  %v1820_v52 = vpack.i.bf16 %v1332_v17, %v1333_v47 }
 0xeef   :  { %v1269_v41 = vsel %vm319_vm12, %v1264_v6, -inf }
 0xef0   :  { %1270 = vmax.xlane.f32.xlu2 %v1269_v41 }
 0xef4   :  { %v1266_v43 = vpop.f32.mrf.mxu3 }
 0xef5   :  { %v1267_v26 = vadd.f32 %v1266_v43, %v2213_v48 }
 0xef7   :  { %v1272_v45 = vsel %vm319_vm12, %v1267_v26, -inf }
 0xef8   :  { %1273 = vmax.xlane.f32.xlu2 %v1272_v45 }
 0xf44   :  { %v2572_v18 = vpop.f32.mrf.mxu1 }
 0xf4c   :  { %v2574_v21 = vpop.f32.mrf.mxu1 }
 0xf53   :  { %v1079_v29 = vpop.xlane.xlu2 %1078 }
 0xf54   :  { %v1083_v25 = vsub.f32 %v1072_v9, %v1079_v29 }
 0xf56   :  { %v1085_v5 = vmul.f32 1.442695, %v1083_v25 }
 0xf58   :  { %1902 = vpow2.f32 %v1085_v5 }
 0xf5b   :  { %v1082_v46 = vpop.xlane.xlu1 %1081 }
 0xf5c   :  { %v1084_v58 = vsub.f32 %v1075_v42, %v1082_v46 }
 0xf5d   :  { %v1361_v54 = vpop.f32.mrf.mxu1 }
 0xf5e   :  { %v1087_v4 = vmul.f32 1.442695, %v1084_v58  ;;  %v1362_v8 = vadd.f32 %v1361_v54, %v2217_v50  ;;  %v1903_v28 = vpop.eup %1902 }
 0xf5f   :  { %v1089_v53 = vsel %vm319_vm12, %v1903_v28, 0.0 }
 0xf60   :  { %1904 = vpow2.f32 %v1087_v4  ;;  %v1367_v20 = vsel %vm319_vm12, %v1362_v8, -inf }
 0xf61   :  { %1368 = vmax.xlane.f32.xlu0 %v1367_v20 }
 0xf63   :  { %v1271_v3 = vpop.xlane.xlu2 %1270 }
 0xf64   :  { %v1275_v15 = vsub.f32 %v1264_v6, %v1271_v3 }
 0xf65   :  { %v1364_v61 = vpop.f32.mrf.mxu1 }
 0xf66   :  { %v2578_v32 = vpop.eup %1904  ;;  %v1277_v34 = vmul.f32 1.442695, %v1275_v15  ;;  %v1365_v0 = vadd.f32 %v1364_v61, %v2213_v48  ;;  %v1036_v48 = vmul.f32 %v2469_v59, %v2322_v44 }
 0xf67   :  { %v1092_v7 = vsel %vm319_vm12, %v2578_v32, 0.0 }
 0xf68   :  { %1906 = vpow2.f32 %v1277_v34  ;;  %1093 = vadd.xlane.f32.xlu2 %v1092_v7  ;;  %v1370_v50 = vsel %vm319_vm12, %v1365_v0, -inf  ;;  %v1815_v14 = vpack.i.bf16 %v1036_v48, %v1037_v39 }
 0xf69   :  { %1371 = vmax.xlane.f32.xlu1 %v1370_v50  ;;  %1090 = vadd.xlane.f32.xlu0 %v1089_v53 }
 0xf6b   :  { %v1274_v37 = vpop.xlane.xlu2 %1273 }
 0xf6c   :  { %v1276_v13 = vsub.f32 %v1267_v26, %v1274_v37 }
 0xf6e   :  { %v1907_v62 = vpop.eup %1906  ;;  %v1279_v56 = vmul.f32 1.442695, %v1276_v13 }
 0xf6f   :  { %v1281_v35 = vsel %vm319_vm12, %v1907_v62, 0.0 }
 0xf70   :  { %1282 = vadd.xlane.f32.xlu2 %v1281_v35 }
 0xf82   :  { %1816 = vrot.lane.b32.xlu1 %v1815_v14, %s1949_s30 }
 0xf8a   :  { %1826 = vrot.lane.b32.xlu1 %v1825_v38, %s1949_s30 }
 0xf92   :  { %1831 = vrot.lane.b32.xlu1 %v1830_v33, %s1951_s2 }
 0xfd4   :  { %v1369_v31 = vpop.xlane.xlu0 %1368 }
 0xfd5   :  { %v1373_v57 = vsub.f32 %v1362_v8, %v1369_v31 }
 0xfd7   :  { %v1375_v44 = vmul.f32 1.442695, %v1373_v57 }
 0xfd9   :  { %1908 = vpow2.f32 %v1375_v44 }
 0xfdb   :  { %v1094_v2 = vpop.xlane.xlu2 %1093 }
 0xfdc   :  { %v1372_v19 = vpop.xlane.xlu1 %1371  ;;  %v1091_v33 = vpop.xlane.xlu0 %1090 }
 0xfdd   :  { %v1374_v49 = vsub.f32 %v1365_v0, %v1372_v19 }
 0xfdf   :  { %v1909_v16 = vpop.eup %1908  ;;  %v1377_v24 = vmul.f32 1.442695, %v1374_v49 }
 0xfe0   :  { %v1379_v23 = vsel %vm319_vm12, %v1909_v16, 0.0 }
 0xfe1   :  { %1910 = vpow2.f32 %v1377_v24  ;;  %1380 = vadd.xlane.f32.xlu0 %v1379_v23 }
 0xfe2   :  { %1912 = vpow2.f32 %v1279_v56  ;;  %v1716_v56 = vld [vmem:[%s2710_s4 + $0x68] sm:$0xff] }
 0xfe3   :  { %1914 = vrcp.f32 %v1091_v33  ;;  %v1283_v6 = vpop.xlane.xlu2 %1282 }
 0xfe4   :  { %1916 = vrcp.f32 %v1094_v2 }
 0xfe5   :  { %1918 = vrcp.f32 %v1283_v6 }
 0xfe7   :  { %v1911_v9 = vpop.eup %1910 }
 0xfe8   :  { %v1382_v51 = vsel %vm319_vm12, %v1911_v9, 0.0  ;;  %v1913_v40 = vpop.eup %1912 }
 0xfe9   :  { %1383 = vadd.xlane.f32.xlu2 %v1382_v51  ;;  %v1284_v42 = vsel %vm319_vm12, %v1913_v40, 0.0  ;;  %v1915_v43 = vpop.eup %1914 }
 0xfea   :  { %v1097_v29 = vmul.f32 %v1915_v43, %v1903_v28  ;;  %v1917_v12 = vpop.eup %1916 }
 0xfeb   :  { %v1919_v25 = vpop.eup %1918  ;;  %v1098_v46 = vmul.f32 %v1917_v12, %v2578_v32 }
 0xfec   :  { %v1289_v59 = vmul.f32 %v1919_v25, %v1907_v62 }
 0xff1   :  { %1285 = vadd.xlane.f32.xlu2 %v1284_v42 }
 0xff4   :  { %v1817_v41 = vpop.permute.xlu1 %1816 }
 0xff5   :  { %v1818_v26 = vunpack.i.l.bf16 %v1817_v41  ;;  %1821 = vrot.lane.b32.xlu0 %v1820_v52, %s1949_s30  ;;  %v1819_v45 = vunpack.i.h.bf16 %v1817_v41 }
 0xff7   :  { %1223 = vmatpush.msrb.mxu2 %v1818_v26 }
 0xff9   :  { %1224 = vmatpush.msrb.mxu2 %v1819_v45 }
 0xffa   :  { %1735 = vmatmul.msk.f32.vlgmr.msrb.gmra.mxu2 %vm319_vm12, %v1097_v29 }
 0xffc   :  { %v1827_v60 = vpop.permute.xlu1 %1826 }
 0xffd   :  { %v1828_v5 = vunpack.i.l.bf16 %v1827_v60  ;;  %1836 = vrot.lane.b32.xlu0 %v1835_v10, %s1951_s2  ;;  %v1829_v22 = vunpack.i.h.bf16 %v1827_v60 }
 0xfff   :  { %1319 = vmatpush.msrb.mxu0 %v1828_v5 }
0x1001   :  { %1320 = vmatpush.msrb.mxu0 %v1829_v22 }
0x1002   :  { %1736 = vmatmul.msk.f32.gmra.mxu2 %vm319_vm12, %v1098_v46  ;;  %1741 = vmatmul.msk.f32.vlgmr.msrb.gmra.mxu0 %vm319_vm12, %v1289_v59 }
0x1004   :  { %v1832_v8 = vpop.permute.xlu1 %1831 }
0x1005   :  { %v1834_v3 = vunpack.i.h.bf16 %v1832_v8  ;;  %v1833_v55 = vunpack.i.l.bf16 %v1832_v8  ;;  %v1760_v8 = vld [vmem:[%s2711_s5 + $0x78] sm:$0xff] }
0x1006   :  { %1583 = vmatpush.msrb.mxu1 %v1760_v8 }
0x1007   :  { %1462 = vmatpush.msrb.mxu3 %v1833_v55  ;;  %v1757_v55 = vld [vmem:[%s2711_s5 + $0x60] sm:$0xff] }
0x1009   :  { %1463 = vmatpush.msrb.mxu3 %v1834_v3  ;;  %v1758_v3 = vld [vmem:[%s2711_s5 + $0x68] sm:$0xff] }
0x1054   :  { %v1381_v54 = vpop.xlane.xlu0 %1380 }
0x1055   :  { %1920 = vrcp.f32 %v1381_v54 }
0x105b   :  { %v1921_v1 = vpop.eup %1920 }
0x105c   :  { %v1384_v58 = vpop.xlane.xlu2 %1383  ;;  %v1387_v61 = vmul.f32 %v1921_v1, %v1909_v16  ;;  %v1756_v1 = vld [vmem:[%s2711_s5 + $0x58] sm:$0xff] }
0x1064   :  { %v1286_v4 = vpop.xlane.xlu2 %1285 }
0x1065   :  { %1922 = vrcp.f32 %v1286_v4 }
0x1066   :  { %1924 = vrcp.f32 %v1384_v58 }
0x1067   :  { %v1822_v20 = vpop.permute.xlu0 %1821 }
0x1068   :  { %v1823_v10 = vunpack.i.l.bf16 %v1822_v20  ;;  %v1824_v15 = vunpack.i.h.bf16 %v1822_v20  ;;  %v1759_v20 = vld [vmem:[%s2711_s5 + $0x70] sm:$0xff] }
0x1069   :  { %1584 = vmatpush.msrb.mxu1 %v1759_v20 }
0x106a   :  { %1417 = vmatpush.msra.mxu2 %v1823_v10  ;;  %v1755_v10 = vld [vmem:[%s2711_s5 + $0x50] sm:$0xff] }
0x106b   :  { %v1923_v28 = vpop.eup %1922  ;;  %1585 = vmatpush.msrb.mxu1 %v1758_v3 }
0x106c   :  { %1418 = vmatpush.msra.mxu2 %v1824_v15  ;;  %v1290_v32 = vmul.f32 %v1923_v28, %v1913_v40  ;;  %v1925_v34 = vpop.eup %1924  ;;  %v1754_v15 = vld [vmem:[%s2711_s5 + $0x48] sm:$0xff] }
0x106d   :  { %1747 = vmatmul.msk.f32.vlgmr.msra.gmra.mxu2 %vm319_vm12, %v1387_v61  ;;  %v1388_v0 = vmul.f32 %v1925_v34, %v1911_v9  ;;  %v1712_v9 = vld [vmem:[%s2710_s4 + $0x48] sm:$0xff]  ;;  %1586 = vmatpush.msrb.mxu1 %v1757_v55  ;;  %v1753_v61 = vld [vmem:[%s2711_s5 + $0x40] sm:$0xff] }
0x106e   :  { %1742 = vmatmul.msk.f32.gmra.mxu0 %vm319_vm12, %v1290_v32 }
0x106f   :  { %v1837_v7 = vpop.permute.xlu0 %1836  ;;  %1587 = vmatpush.msrb.mxu1 %v1756_v1 }
0x1070   :  { %v1839_v50 = vunpack.i.h.bf16 %v1837_v7  ;;  %v1838_v53 = vunpack.i.l.bf16 %v1837_v7 }
0x1071   :  { %1588 = vmatpush.msrb.mxu1 %v1755_v10 }
0x1072   :  { %1464 = vmatpush.msrb.mxu3 %v1838_v53 }
0x1073   :  { %1589 = vmatpush.msrb.mxu1 %v1754_v15 }
0x1074   :  { %1465 = vmatpush.msrb.mxu3 %v1839_v50 }
0x1075   :  { %1748 = vmatmul.msk.f32.gmra.mxu2 %vm319_vm12, %v1388_v0  ;;  %1590 = vmatpush.msrb.mxu1 %v1753_v61 }
0x107d   :  { %v1226_v62 = vpop.f32.mrf.mxu2 }
0x107e   :  { %v1227_v39 = vadd.f32 %v1226_v62, %v2572_v18 }
0x107f   :  { %v1322_v48 = vpop.f32.mrf.mxu0 }
0x1080   :  { %v1328_v14 = vadd.f32 %v1322_v48, %v1227_v39 }
0x1085   :  { %v1229_v35 = vpop.f32.mrf.mxu2 }
0x1086   :  { %v1230_v31 = vadd.f32 %v1229_v35, %v2574_v21 }
0x10eb   :  { %v1325_v38 = vpop.f32.mrf.mxu0 }
0x10ec   :  { %v1329_v57 = vadd.f32 %v1325_v38, %v1230_v31 }
0x10f0   :  { %v1420_v27 = vpop.f32.mrf.mxu2 }
0x10f1   :  { %v1426_v11 = vadd.f32 %v1420_v27, %v1328_v14 }
0x10f3   :  { %1749 = vmatmul.msk.f32.vlgmr.msrb.gmra.mxu3 %vm93_vm3, %v1426_v11 }
0x10f8   :  { %v1423_v44 = vpop.f32.mrf.mxu2 }
0x10f9   :  { %v1427_v37 = vadd.f32 %v1423_v44, %v1329_v57 }
0x10fb   :  { %1750 = vmatmul.msk.f32.gmra.mxu3 %vm93_vm3, %v1427_v37 }
0x1176   :  { %v1467_v19 = vpop.f32.mrf.mxu3 }
0x1177   :  { %v2624_v49 = vadd.f32 %v1467_v19, %v2424_v30  ;;  %v1718_v30 = vld [vmem:[%s2710_s4 + $0x78] sm:$0xff] }
0x1178   :  { %1527 = vmatpush.msra.mxu0 %v1718_v30  ;;  %v1635_v30 = vld [vmem:[%s2712_s3 + $0x8] sm:$0xff] }
0x1179   :  { %v1475_v18 = vmul.f32 %v2624_v49, %v2624_v49 }
0x117a   :  { %1528 = vmatpush.msra.mxu0 %v1716_v56 }
0x117b   :  { %v1477_v16 = vsel %vm93_vm3, %v1475_v18, 0.0 }
0x117c   :  { %1478 = vadd.xlane.f32.xlu2 %v1477_v16 }
0x117e   :  { %v1470_v13 = vpop.f32.mrf.mxu3 }
0x117f   :  { %v2630_v24 = vadd.f32 %v1470_v13, %v2430_v63  ;;  %v1714_v63 = vld [vmem:[%s2710_s4 + $0x58] sm:$0xff] }
0x1180   :  { %1529 = vmatpush.msra.mxu0 %v1714_v63 }
0x1181   :  { %v1476_v21 = vmul.f32 %v2630_v24, %v2630_v24 }
0x1182   :  { %1530 = vmatpush.msra.mxu0 %v1712_v9 }
0x1183   :  { %v1480_v23 = vsel %vm93_vm3, %v1476_v21, 0.0 }
0x1184   :  { %1481 = vadd.xlane.f32.xlu1 %v1480_v23  ;;  %v1637_v23 = vld [vmem:[%s2712_s3 + $0x18] sm:$0xff] }
0x1185   :  { %1656 = vmatpush.msrb.mxu2 %v1637_v23 }
0x11ef   :  { %v1479_v51 = vpop.xlane.xlu2 %1478 }
0x11f0   :  { %v1483_v2 = vmul.f32 %v1479_v51, %v2075_v36 }
0x11f2   :  { %v1485_v33 = vadd.f32 1e-05, %v1483_v2 }
0x11f4   :  { %1926 = vrsqrt.f32 %v1485_v33  ;;  %vm1493_vm13 = vweird.f32 %v1485_v33 }
0x11f7   :  { %v1482_v40 = vpop.xlane.xlu1 %1481 }
0x11f8   :  { %v1484_v47 = vmul.f32 %v1482_v40, %v2075_v36 }
0x11fa   :  { %v1927_v42 = vpop.eup %1926  ;;  %v1486_v17 = vadd.f32 1e-05, %v1484_v47 }
0x11fb   :  { %v1488_v52 = vmul.f32 %v1927_v42, %v1485_v33  ;;  %vm1494_vm12 = vweird.f32 %v1927_v42 }
0x11fc   :  { %1928 = vrsqrt.f32 %v1486_v17  ;;  %vm1495_vm14 = vmor %vm1493_vm13, %vm1494_vm12  ;;  %vm1503_vm1 = vweird.f32 %v1486_v17 }
0x11fd   :  { %v1489_v6 = vmul.f32 %v1927_v42, %v1488_v52 }
0x11ff   :  { %v1490_v41 = vmul.f32 0.5, %v1489_v6 }
0x1201   :  { %v1491_v43 = vsub.f32 1.5, %v1490_v41 }
0x1202   :  { %v1929_v26 = vpop.eup %1928 }
0x1203   :  { %v1492_v45 = vmul.f32 %v1927_v42, %v1491_v43  ;;  %v1498_v29 = vmul.f32 %v1929_v26, %v1486_v17  ;;  %vm1504_vm15 = vweird.f32 %v1929_v26 }
0x1204   :  { %vm1505_vm2 = vmor %vm1503_vm1, %vm1504_vm15 }
0x1205   :  { %v1496_v12 = vsel %vm1495_vm14, %v1927_v42, %v1492_v45  ;;  %v1499_v60 = vmul.f32 %v1929_v26, %v1498_v29 }
0x1206   :  { %v1507_v25 = vmul.f32 %v1496_v12, %v2624_v49 }
0x1207   :  { %v1500_v5 = vmul.f32 0.5, %v1499_v60 }
0x1208   :  { %1751 = vmatmul.msk.f32.vlgmr.msra.gmra.mxu0 %vm93_vm3, %v1507_v25 }
0x1209   :  { %v1501_v22 = vsub.f32 1.5, %v1500_v5 }
0x120b   :  { %v1502_v59 = vmul.f32 %v1929_v26, %v1501_v22 }
0x120d   :  { %v1506_v46 = vsel %vm1505_vm2, %v1929_v26, %v1502_v59 }
0x120e   :  { %v1508_v58 = vmul.f32 %v1506_v46, %v2630_v24 }
0x1210   :  { %1752 = vmatmul.msk.f32.gmra.mxu0 %vm93_vm3, %v1508_v58 }
0x1285   :  { %v1532_v54 = vpop.f32.mrf.mxu0 }
0x1286   :  { %1552 = vrot.lane.b32.xlu0 %v1532_v54, %s1949_s30  ;;  %v1538_v28 = vsub.f32 0.0, %v1532_v54 }
0x1288   :  { %v1540_v32 = vmul.f32 1.442695, %v1538_v28 }
0x128a   :  { %1930 = vpow2.f32 %v1540_v32 }
0x128d   :  { %v1535_v4 = vpop.f32.mrf.mxu0 }
0x128e   :  { %1554 = vrot.lane.b32.xlu2 %v1535_v4, %s1949_s30  ;;  %v1539_v34 = vsub.f32 0.0, %v1535_v4 }
0x1290   :  { %v1542_v0 = vmul.f32 1.442695, %v1539_v34  ;;  %v1931_v7 = vpop.eup %1930 }
0x1291   :  { %v1544_v50 = vadd.f32 1.0, %v1931_v7 }
0x1292   :  { %1932 = vpow2.f32 %v1542_v0 }
0x1293   :  { %1934 = vrcp.f32 %v1544_v50 }
0x1298   :  { %v1933_v53 = vpop.eup %1932 }
0x1299   :  { %v1545_v62 = vadd.f32 1.0, %v1933_v53  ;;  %v1935_v35 = vpop.eup %1934 }
0x129a   :  { %v1548_v39 = vmul.f32 %v1935_v35, %v1532_v54 }
0x129b   :  { %1936 = vrcp.f32 %v1545_v62 }
0x12a1   :  { %v1937_v27 = vpop.eup %1936 }
0x12a2   :  { %v1549_v38 = vmul.f32 %v1937_v27, %v1535_v4 }
0x12e8   :  { %v1555_v11 = vpop.permute.xlu2 %1554 }
0x12e9   :  { %v1559_v31 = vmul.f32 %v1555_v11, %v1549_v38 }
0x12f8   :  { %v1553_v48 = vpop.permute.xlu0 %1552 }
0x12f9   :  { %v1558_v14 = vmul.f32 %v1553_v48, %v1548_v39 }
0x12fb   :  { %1761 = vmatmul.msk.f32.vlgmr.msrb.gmra.mxu1 %vm53_vm0, %v1558_v14 }
0x1303   :  { %1762 = vmatmul.msk.f32.gmra.mxu1 %vm53_vm0, %v1559_v31 }
0x1378   :  { %v1592_v57 = vpop.f32.mrf.mxu1 }
0x1379   :  { %v1598_v44 = vadd.f32 %v1592_v57, %v2624_v49  ;;  %v1636_v49 = vld [vmem:[%s2712_s3 + $0x10] sm:$0xff] }
0x137a   :  { %1657 = vmatpush.msrb.mxu2 %v1636_v49 }
0x137b   :  { %v1600_v37 = vmul.f32 %v1598_v44, %v1598_v44 }
0x137c   :  { %1658 = vmatpush.msrb.mxu2 %v1635_v30 }
0x137d   :  { %v1602_v19 = vsel %vm93_vm3, %v1600_v37, 0.0 }
0x137e   :  { %1603 = vadd.xlane.f32.xlu0 %v1602_v19 }
0x1380   :  { %v1595_v18 = vpop.f32.mrf.mxu1 }
0x1381   :  { %v1599_v16 = vadd.f32 %v1595_v18, %v2630_v24  ;;  %v1634_v24 = vld [vmem:[%s2712_s3] sm:$0xff] }
0x1382   :  { %1659 = vmatpush.msrb.mxu2 %v1634_v24 }
0x1383   :  { %v1601_v13 = vmul.f32 %v1599_v16, %v1599_v16 }
0x1385   :  { %v1605_v21 = vsel %vm93_vm3, %v1601_v13, 0.0 }
0x1386   :  { %1606 = vadd.xlane.f32.xlu2 %v1605_v21 }
0x13f1   :  { %v1604_v56 = vpop.xlane.xlu0 %1603 }
0x13f2   :  { %v1608_v63 = vmul.f32 %v1604_v56, %v2075_v36 }
0x13f4   :  { %v1610_v9 = vadd.f32 1e-05, %v1608_v63 }
0x13f6   :  { %1938 = vrsqrt.f32 %v1610_v9  ;;  %vm1618_vm4 = vweird.f32 %v1610_v9 }
0x13f9   :  { %v1607_v51 = vpop.xlane.xlu2 %1606 }
0x13fa   :  { %v1609_v2 = vmul.f32 %v1607_v51, %v2075_v36 }
0x13fc   :  { %v1939_v33 = vpop.eup %1938  ;;  %v1611_v40 = vadd.f32 1e-05, %v1609_v2 }
0x13fd   :  { %v1613_v47 = vmul.f32 %v1939_v33, %v1610_v9  ;;  %vm1619_vm0 = vweird.f32 %v1939_v33 }
0x13fe   :  { %1940 = vrsqrt.f32 %v1611_v40  ;;  %vm1620_vm5 = vmor %vm1618_vm4, %vm1619_vm0  ;;  %vm1628_vm7 = vweird.f32 %v1611_v40 }
0x13ff   :  { %v1614_v42 = vmul.f32 %v1939_v33, %v1613_v47 }
0x1401   :  { %v1615_v17 = vmul.f32 0.5, %v1614_v42 }
0x1403   :  { %v1616_v52 = vsub.f32 1.5, %v1615_v17 }
0x1404   :  { %v1941_v6 = vpop.eup %1940 }
0x1405   :  { %v1617_v41 = vmul.f32 %v1939_v33, %v1616_v52  ;;  %v1623_v43 = vmul.f32 %v1941_v6, %v1611_v40  ;;  %vm1629_vm6 = vweird.f32 %v1941_v6 }
0x1406   :  { %vm1630_vm8 = vmor %vm1628_vm7, %vm1629_vm6 }
0x1407   :  { %v1621_v26 = vsel %vm1620_vm5, %v1939_v33, %v1617_v41  ;;  %v1624_v45 = vmul.f32 %v1941_v6, %v1623_v43 }
0x1408   :  { %v1632_v29 = vmul.f32 %v1621_v26, %v1598_v44 }
0x1409   :  { %v1625_v12 = vmul.f32 0.5, %v1624_v45 }
0x140a   :  { %1763 = vmatmul.msk.f32.vlgmr.msrb.gmra.mxu2 %vm93_vm3, %v1632_v29 }
0x140b   :  { %v1626_v36 = vsub.f32 1.5, %v1625_v12 }
0x140d   :  { %v1627_v60 = vmul.f32 %v1941_v6, %v1626_v36 }
0x140f   :  { %v1631_v25 = vsel %vm1630_vm8, %v1941_v6, %v1627_v60 }
0x1410   :  { %v1633_v5 = vmul.f32 %v1631_v25, %v1599_v16 }
0x1412   :  { %1764 = vmatmul.msk.f32.gmra.mxu2 %vm93_vm3, %v1633_v5 }
0x148d   :  { %v1661_v22 = vpop.f32.mrf.mxu2 }
0x148e   :  { %1667 = vst [vmem:[%s2713_s6] sm:$0xff] %v1661_v22 }
0x1495   :  { %v1664_v59 = vpop.f32.mrf.mxu2 }
0x1496   :  { %1668 = vst [vmem:[%s2713_s6 + $0x8] sm:$0xff] %v1664_v59 }

</bundles_post_ra>
